<compile_context>
chip_gen: v7x
topology: tpu7x:2x2x1
jax: 0.10.0
libtpu: 0.0.40
codegen_flags: <defaults>
</compile_context>

<pallas_src>
import functools
import math

import jax
import jax.numpy as jnp
from jax import lax
from jax.experimental import pallas as pl
from jax.experimental.pallas import tpu as pltpu


# Rows of the packed per-layer vector table (biases / layernorm params).
R_BQ, R_BK, R_BV, R_BO = 0, 1, 2, 3
R_LN1_G, R_LN1_B = 4, 5
R_B1, R_B2 = 6, 7
R_LN2_G, R_LN2_B = 8, 9
NUM_VEC_ROWS = 10


def _layer_norm(v, g, b, eps=1e-5):
    mu = jnp.mean(v, axis=-1, keepdims=True)
    var = jnp.mean(jnp.square(v - mu), axis=-1, keepdims=True)
    return (v - mu) * lax.rsqrt(var + eps) * g + b


# ----------------------------------------------------------------------------
# Kernel: one grid step == one EncoderBlock applied to one batch tile whose
# activation lives (f32) in the resident output block across all layers.
# ----------------------------------------------------------------------------
def encoder_stack_kernel(
    x_ref, bias_ref, vec_ref,
    wq_ref, wk_ref, wv_ref, wo_ref, w1_ref, w2_ref,
    out_ref,
    *, num_head,
):
    layer = pl.program_id(1)

    # Load the input activation into the resident output block once per batch
    # tile; it then serves as the cross-layer accumulator (no extra scratch).
    @pl.when(layer == 0)
    def _():
        out_ref[0] = x_ref[0].astype(out_ref.dtype)

    _, bt, S = bias_ref.shape
    _, Mt, D = out_ref.shape
    H = num_head
    dh = D // H
    Fdim = w1_ref.shape[-1]
    cdt = wq_ref.dtype                        # matmul compute dtype (bf16)

    h = out_ref[0]                            # (Mt, D) f32 resident activation
    bias = bias_ref[0]                        # (bt, S): 0 keep / -1e9 masked
    bias_b = bias[:, None, :]                 # hoisted broadcast (bt, 1, S)
    vecs = vec_ref[0]                         # (NUM_VEC_ROWS, P) f32

    def vrow(r, n):
        return vecs[r:r + 1, :n]              # (1, n)

    h_c = h.astype(cdt)

    # ---- multi-head self attention (heads unrolled; no big-tensor relayouts)
    attn = jnp.zeros((Mt, D), jnp.float32)
    for hd in range(H):
        lo = hd * dh
        bq_h = vecs[R_BQ:R_BQ + 1, lo:lo + dh]
        bk_h = vecs[R_BK:R_BK + 1, lo:lo + dh]
        bv_h = vecs[R_BV:R_BV + 1, lo:lo + dh]

        # 1/sqrt(dh) is already folded into wq / bq by the wrapper.
        q = jnp.dot(h_c, wq_ref[0, hd], preferred_element_type=jnp.float32) + bq_h
        k = jnp.dot(h_c, wk_ref[0, hd], preferred_element_type=jnp.float32) + bk_h
        v = jnp.dot(h_c, wv_ref[0, hd], preferred_element_type=jnp.float32) + bv_h

        qb = q.reshape(bt, S, dh).astype(cdt)   # leading-axis split: free
        kb = k.reshape(bt, S, dh).astype(cdt)
        vb = v.reshape(bt, S, dh).astype(cdt)

        s = jnp.einsum("bqd,bkd->bqk", qb, kb,
                       preferred_element_type=jnp.float32)   # (bt, S, S)
        s = s + bias_b
        s = s - jnp.max(s, axis=-1, keepdims=True)
        p = jnp.exp(s)
        p = p * pl.reciprocal(jnp.sum(p, axis=-1, keepdims=True), approx=True)

        ctx = jnp.einsum("bqk,bkd->bqd", p.astype(cdt), vb,
                         preferred_element_type=jnp.float32)  # (bt, S, dh)
        ctx = ctx.reshape(Mt, dh).astype(cdt)                 # free merge
        attn = attn + jnp.dot(ctx, wo_ref[0, hd],
                              preferred_element_type=jnp.float32)
    attn = attn + vrow(R_BO, D)

    # dropout is identity in eval mode; post-LN residual
    h1 = _layer_norm(h + attn, vrow(R_LN1_G, D), vrow(R_LN1_B, D))

    # ---- position-wise feed forward -----------------------------------------
    f = jnp.dot(h1.astype(cdt), w1_ref[0],
                preferred_element_type=jnp.float32) + vrow(R_B1, Fdim)
    f = jnp.maximum(f, 0.0)
    f = jnp.dot(f.astype(cdt), w2_ref[0],
                preferred_element_type=jnp.float32) + vrow(R_B2, D)

    h2 = _layer_norm(h1 + f, vrow(R_LN2_G, D), vrow(R_LN2_B, D))

    out_ref[0] = h2.astype(out_ref.dtype)


# ----------------------------------------------------------------------------
# Wrapper: one fused pallas_call over all layers (and batch tiles).
# ----------------------------------------------------------------------------
def encoder_forward_pallas(x, encoder_mask, layer_params, num_head,
                           compute_dtype=jnp.bfloat16, batch_tiles=1):
    """Equivalent of Encoder.forward (eval mode)."""
    B, S, D = x.shape
    L = len(layer_params)
    H = num_head
    assert D % H == 0
    assert B % batch_tiles == 0
    dh = D // H
    Fdim = layer_params[0]["w1"].shape[-1]
    T = batch_tiles                 # parallel batch-tile axis (megacore on v7x)
    bt = B // T
    Mt = bt * S
    scale = 1.0 / math.sqrt(dh)

    def stack(name):
        return jnp.stack([p[name] for p in layer_params]).astype(jnp.float32)

    # Head-major weight layouts (bf16), attention scale folded into Wq.
    wq = (stack("wq") * scale).reshape(L, D, H, dh).transpose(0, 2, 1, 3).astype(compute_dtype)
    wk = stack("wk").reshape(L, D, H, dh).transpose(0, 2, 1, 3).astype(compute_dtype)
    wv = stack("wv").reshape(L, D, H, dh).transpose(0, 2, 1, 3).astype(compute_dtype)
    wo = stack("wo").reshape(L, H, dh, D).astype(compute_dtype)
    w1 = stack("w1").astype(compute_dtype)
    w2 = stack("w2").astype(compute_dtype)

    # Pack all tiny per-layer vectors into one (L, NUM_VEC_ROWS, P) table.
    P = max(D, Fdim)

    def row(name, mul=None):
        v = stack(name).reshape(L, -1)
        if mul is not None:
            v = v * mul
        return jnp.pad(v, ((0, 0), (0, P - v.shape[1])))

    vec_pack = jnp.stack(
        [row("bq", scale), row("bk"), row("bv"), row("bo"),
         row("ln1_g"), row("ln1_b"),
         row("b1"), row("b2"),
         row("ln2_g"), row("ln2_b")], axis=1)            # (L, NUM_VEC_ROWS, P)

    x_tiled = x.reshape(T, Mt, D).astype(jnp.float32)
    # Additive attention bias: 0 where mask==1, -1e9 where mask==0.
    mask_bias = ((encoder_mask.reshape(B, S).astype(jnp.float32) - 1.0)
                 * 1e9).reshape(T, bt, S)

    def act_spec(shape):                     # indexed by the batch-tile axis
        n = len(shape)
        return pl.BlockSpec((1,) + tuple(shape[1:]),
                            lambda t, l, _n=n: (t,) + (0,) * (_n - 1))

    def wt_spec(shape):                      # indexed by the layer axis
        n = len(shape)
        return pl.BlockSpec((1,) + tuple(shape[1:]),
                            lambda t, l, _n=n: (l,) + (0,) * (_n - 1))

    in_specs = [
        act_spec(x_tiled.shape),
        act_spec(mask_bias.shape),
        wt_spec(vec_pack.shape),
        wt_spec(wq.shape), wt_spec(wk.shape), wt_spec(wv.shape), wt_spec(wo.shape),
        wt_spec(w1.shape), wt_spec(w2.shape),
    ]
    out_specs = act_spec(x_tiled.shape)

    # Explicit VMEM budget: double-buffered bf16 weights + packed vectors +
    # resident activation blocks + per-layer working set, with headroom.
    bytes_w = 2 * 2 * (4 * D * D + 2 * D * Fdim)
    bytes_vec = 2 * 4 * NUM_VEC_ROWS * P
    bytes_act = 2 * 2 * Mt * D * 4 + 2 * bt * S * 4
    bytes_work = 6 * Mt * D * 4 + Mt * Fdim * 4 + 6 * bt * S * S * 4 + 8 * Mt * dh * 4
    vmem_limit = int(1.5 * (bytes_w + bytes_vec + bytes_act + bytes_work)) + (1 << 20)
    vmem_limit = max(4 << 20, min(vmem_limit, 100 << 20))

    kernel = functools.partial(encoder_stack_kernel, num_head=num_head)
    out = pl.pallas_call(
        kernel,
        out_shape=jax.ShapeDtypeStruct((T, Mt, D), x.dtype),
        grid=(T, L),
        in_specs=in_specs,
        out_specs=out_specs,
        compiler_params=pltpu.CompilerParams(
            dimension_semantics=("parallel", "arbitrary"),
            vmem_limit_bytes=vmem_limit),
    )(x_tiled, mask_bias, vec_pack, wq, wk, wv, wo, w1, w2)

    return out.reshape(B, S, D)


# ----------------------------------------------------------------------------
# Deterministic parameter init (shapes follow EncoderBlock(d_model, ff_dim, ...)).
# ----------------------------------------------------------------------------
def init_layer_params(key, d_model, ff_dim):
    ks = jax.random.split(key, 12)
    s_d = 1.0 / math.sqrt(d_model)
    s_f = 1.0 / math.sqrt(ff_dim)
    return {
        # attention projections (stored as (in, out))
        "wq": jax.random.normal(ks[0], (d_model, d_model), jnp.float32) * s_d,
        "bq": jax.random.normal(ks[1], (1, d_model), jnp.float32) * 0.01,
        "wk": jax.random.normal(ks[2], (d_model, d_model), jnp.float32) * s_d,
        "bk": jax.random.normal(ks[3], (1, d_model), jnp.float32) * 0.01,
        "wv": jax.random.normal(ks[4], (d_model, d_model), jnp.float32) * s_d,
        "bv": jax.random.normal(ks[5], (1, d_model), jnp.float32) * 0.01,
        "wo": jax.random.normal(ks[6], (d_model, d_model), jnp.float32) * s_d,
        "bo": jax.random.normal(ks[7], (1, d_model), jnp.float32) * 0.01,
        # layer norms (torch default init: gamma=1, beta=0)
        "ln1_g": jnp.ones((1, d_model), jnp.float32),
        "ln1_b": jnp.zeros((1, d_model), jnp.float32),
        "ln2_g": jnp.ones((1, d_model), jnp.float32),
        "ln2_b": jnp.zeros((1, d_model), jnp.float32),
        # feed forward
        "w1": jax.random.normal(ks[8], (d_model, ff_dim), jnp.float32) * s_d,
        "b1": jax.random.normal(ks[9], (1, ff_dim), jnp.float32) * 0.01,
        "w2": jax.random.normal(ks[10], (ff_dim, d_model), jnp.float32) * s_f,
        "b2": jax.random.normal(ks[11], (1, d_model), jnp.float32) * 0.01,
    }


# ----------------------------------------------------------------------------
# Pure-JAX reference. compute_dtype=f32 gives the exact PyTorch-style math;
# compute_dtype=bf16 mirrors the kernel's mixed-precision matmuls.
# ----------------------------------------------------------------------------
def reference_forward(x, encoder_mask, layer_params, num_head,
                      compute_dtype=jnp.float32):
    B, S, D = x.shape
    H = num_head
    dh = D // H
    scale = 1.0 / math.sqrt(dh)
    mask = encoder_mask.reshape(B, 1, 1, S).astype(jnp.float32)
    add_bias = (mask - 1.0) * 1e9

    def ln(v, g, b, eps=1e-5):
        mu = jnp.mean(v, axis=-1, keepdims=True)
        var = jnp.mean((v - mu) ** 2, axis=-1, keepdims=True)
        return (v - mu) / jnp.sqrt(var + eps) * g + b

    def mm(a, w):
        return jnp.dot(a.astype(compute_dtype), w.astype(compute_dtype),
                       preferred_element_type=jnp.float32)

    h = x
    for p in layer_params:
        q = mm(h, p["wq"] * scale) + p["bq"] * scale
        k = mm(h, p["wk"]) + p["bk"]
        v = mm(h, p["wv"]) + p["bv"]
        q = q.reshape(B, S, H, dh).transpose(0, 2, 1, 3)
        k = k.reshape(B, S, H, dh).transpose(0, 2, 1, 3)
        v = v.reshape(B, S, H, dh).transpose(0, 2, 1, 3)
        scores = jnp.einsum("bhqd,bhkd->bhqk",
                            q.astype(compute_dtype), k.astype(compute_dtype),
                            preferred_element_type=jnp.float32)
        scores = scores + add_bias
        attn = jax.nn.softmax(scores, axis=-1)
        ctx = jnp.einsum("bhqk,bhkd->bhqd",
                         attn.astype(compute_dtype), v.astype(compute_dtype),
                         preferred_element_type=jnp.float32)
        ctx = ctx.transpose(0, 2, 1, 3).reshape(B, S, D)
        a = mm(ctx, p["wo"]) + p["bo"]
        h = ln(h + a, p["ln1_g"], p["ln1_b"])
        f = jnp.maximum(mm(h, p["w1"]) + p["b1"], 0.0)
        f = mm(f, p["w2"]) + p["b2"]
        h = ln(h + f, p["ln2_g"], p["ln2_b"])
    return h


if __name__ == "__main__":
    num_encoder_block = 2
    d_model = 32
    ff_dim = 64
    num_head = 4
    B, S = 2, 8

    key = jax.random.PRNGKey(0)
    kx, kp = jax.random.split(key)
    x = jax.random.normal(kx, (B, S, d_model), jnp.float32)

    # encoder_mask: (B, 1, 1, S); batch 1 has its last two key positions masked.
    mask = jnp.ones((B, 1, 1, S), jnp.float32)
    mask = mask.at[1, 0, 0, S - 2:].set(0.0)

    layer_params = [
        init_layer_params(jax.random.fold_in(kp, i), d_model, ff_dim)
        for i in range(num_encoder_block)
    ]

    # Single batch tile (v5e / v6e style).
    out = encoder_forward_pallas(x, mask, layer_params, num_head, batch_tiles=1)
    out = jax.block_until_ready(out)
    assert out.shape == (B, S, d_model)

    # Two batch tiles (exercises the parallel megacore axis used on v7x).
    out_bt2 = encoder_forward_pallas(x, mask, layer_params, num_head,
                                     batch_tiles=2)
    out_bt2 = jax.block_until_ready(out_bt2)
    assert jnp.allclose(out, out_bt2, atol=1e-5, rtol=1e-5), \
        "batch-tiled result differs from single-tile result"

    # Tight check vs. a reference that mirrors the kernel's bf16 matmuls.
    ref_mixed = reference_forward(x, mask, layer_params, num_head,
                                  compute_dtype=jnp.bfloat16)
    assert jnp.allclose(out, ref_mixed, atol=1e-2, rtol=1e-2), \
        "mismatch vs. bf16-matmul reference"

    # Looser sanity check vs. the exact f32 (PyTorch-equivalent) reference.
    ref_f32 = reference_forward(x, mask, layer_params, num_head,
                                compute_dtype=jnp.float32)
    assert jnp.allclose(out, ref_f32, atol=7e-2, rtol=7e-2), \
        "mismatch vs. f32 reference"

    print("KERNEL_OK")
</pallas_src>

<mosaic_0001>
module attributes {stable_mosaic.version = 11 : i64} {
  func.func @encoder_stack_kernel(%arg0: i32, %arg1: i32, %arg2: memref<1x16x32xf32, #tpu.memory_space<vmem>>, %arg3: memref<1x2x8xf32, #tpu.memory_space<vmem>>, %arg4: memref<1x10x64xf32, #tpu.memory_space<vmem>>, %arg5: memref<1x4x32x8xbf16, #tpu.memory_space<vmem>>, %arg6: memref<1x4x32x8xbf16, #tpu.memory_space<vmem>>, %arg7: memref<1x4x32x8xbf16, #tpu.memory_space<vmem>>, %arg8: memref<1x4x8x32xbf16, #tpu.memory_space<vmem>>, %arg9: memref<1x32x64xbf16, #tpu.memory_space<vmem>>, %arg10: memref<1x64x32xbf16, #tpu.memory_space<vmem>>, %arg11: memref<1x16x32xf32, #tpu.memory_space<vmem>>) attributes {dimension_semantics = [#tpu.dimension_semantics<parallel>, #tpu.dimension_semantics<arbitrary>], iteration_bounds = array<i64: 1, 2>, scalar_prefetch = 0 : i64, scratch_operands = 0 : i64, tpu.core_type = #tpu.core_type<tc>, window_params = [{transform_indices = @transform_0, window_bounds = array<i64: 1, 16, 32>}, {transform_indices = @transform_1, window_bounds = array<i64: 1, 2, 8>}, {transform_indices = @transform_2, window_bounds = array<i64: 1, 10, 64>}, {transform_indices = @transform_3, window_bounds = array<i64: 1, 4, 32, 8>}, {transform_indices = @transform_4, window_bounds = array<i64: 1, 4, 32, 8>}, {transform_indices = @transform_5, window_bounds = array<i64: 1, 4, 32, 8>}, {transform_indices = @transform_6, window_bounds = array<i64: 1, 4, 8, 32>}, {transform_indices = @transform_7, window_bounds = array<i64: 1, 32, 64>}, {transform_indices = @transform_8, window_bounds = array<i64: 1, 64, 32>}, {transform_indices = @transform_9, window_bounds = array<i64: 1, 16, 32>}]} {
    %c0_i32 = arith.constant 0 : i32
    %0 = arith.cmpi eq, %arg1, %c0_i32 : i32
    %1 = arith.extui %0 : i1 to i32
    %c0_i32_0 = arith.constant 0 : i32
    %2 = arith.cmpi ne, %1, %c0_i32_0 : i32
    scf.if %2 {
      %c0_124 = arith.constant 0 : index
      %c0_125 = arith.constant 0 : index
      %c0_126 = arith.constant 0 : index
      %264 = vector.load %arg2[%c0_124, %c0_125, %c0_126] : memref<1x16x32xf32, #tpu.memory_space<vmem>>, vector<1x16x32xf32>
      %265 = vector.shape_cast %264 : vector<1x16x32xf32> to vector<16x32xf32>
      %c0_127 = arith.constant 0 : index
      %c0_128 = arith.constant 0 : index
      %c0_129 = arith.constant 0 : index
      %266 = vector.load %arg11[%c0_127, %c0_128, %c0_129] : memref<1x16x32xf32, #tpu.memory_space<vmem>>, vector<1x16x32xf32>
      %267 = vector.shape_cast %266 : vector<1x16x32xf32> to vector<16x32xf32>
      %268 = vector.shape_cast %265 : vector<16x32xf32> to vector<1x16x32xf32>
      tpu.vector_store %arg11[%c0_127, %c0_128, %c0_129], %268 {strides = array<i32>} : memref<1x16x32xf32, #tpu.memory_space<vmem>>, vector<1x16x32xf32>,
    } else {
    }
    %c0 = arith.constant 0 : index
    %c0_1 = arith.constant 0 : index
    %c0_2 = arith.constant 0 : index
    %3 = vector.load %arg11[%c0, %c0_1, %c0_2] : memref<1x16x32xf32, #tpu.memory_space<vmem>>, vector<1x16x32xf32>
    %4 = vector.shape_cast %3 : vector<1x16x32xf32> to vector<16x32xf32>
    %c0_3 = arith.constant 0 : index
    %c0_4 = arith.constant 0 : index
    %c0_5 = arith.constant 0 : index
    %5 = vector.load %arg3[%c0_3, %c0_4, %c0_5] : memref<1x2x8xf32, #tpu.memory_space<vmem>>, vector<1x2x8xf32>
    %6 = vector.shape_cast %5 : vector<1x2x8xf32> to vector<2x8xf32>
    %7 = vector.shape_cast %6 : vector<2x8xf32> to vector<2x1x8xf32>
    %c0_6 = arith.constant 0 : index
    %c0_7 = arith.constant 0 : index
    %c0_8 = arith.constant 0 : index
    %8 = vector.load %arg4[%c0_6, %c0_7, %c0_8] : memref<1x10x64xf32, #tpu.memory_space<vmem>>, vector<1x10x64xf32>
    %9 = vector.shape_cast %8 : vector<1x10x64xf32> to vector<10x64xf32>
    %10 = arith.truncf %4 : vector<16x32xf32> to vector<16x32xbf16>
    %cst = arith.constant 0.000000e+00 : f32
    %11 = vector.broadcast %cst : f32 to vector<16x32xf32>
    %12 = vector.extract_strided_slice %9 {offsets = [0, 0], sizes = [1, 8], strides = [1, 1]} : vector<10x64xf32> to vector<1x8xf32>
    %13 = vector.extract_strided_slice %9 {offsets = [1, 0], sizes = [1, 8], strides = [1, 1]} : vector<10x64xf32> to vector<1x8xf32>
    %14 = vector.extract_strided_slice %9 {offsets = [2, 0], sizes = [1, 8], strides = [1, 1]} : vector<10x64xf32> to vector<1x8xf32>
    %c0_9 = arith.constant 0 : index
    %c0_10 = arith.constant 0 : index
    %c0_11 = arith.constant 0 : index
    %c0_12 = arith.constant 0 : index
    %15 = vector.load %arg5[%c0_9, %c0_10, %c0_11, %c0_12] : memref<1x4x32x8xbf16, #tpu.memory_space<vmem>>, vector<1x1x32x8xbf16>
    %16 = vector.shape_cast %15 : vector<1x1x32x8xbf16> to vector<32x8xbf16>
    %cst_13 = arith.constant dense<0.000000e+00> : vector<16x8xf32>
    %17 = tpu.matmul %10, %16, %cst_13 {dimension_numbers = #tpu.dot_dimension_numbers<[1], [0], [0], [1], [0, 0, 1, 1], [], []>} : vector<16x32xbf16>, vector<32x8xbf16>, vector<16x8xf32> -> vector<16x8xf32>
    %18 = vector.broadcast %12 : vector<1x8xf32> to vector<16x8xf32>
    %19 = arith.addf %17, %18 : vector<16x8xf32>
    %c0_14 = arith.constant 0 : index
    %c0_15 = arith.constant 0 : index
    %c0_16 = arith.constant 0 : index
    %c0_17 = arith.constant 0 : index
    %20 = vector.load %arg6[%c0_14, %c0_15, %c0_16, %c0_17] : memref<1x4x32x8xbf16, #tpu.memory_space<vmem>>, vector<1x1x32x8xbf16>
    %21 = vector.shape_cast %20 : vector<1x1x32x8xbf16> to vector<32x8xbf16>
    %cst_18 = arith.constant dense<0.000000e+00> : vector<16x8xf32>
    %22 = tpu.matmul %10, %21, %cst_18 {dimension_numbers = #tpu.dot_dimension_numbers<[1], [0], [0], [1], [0, 0, 1, 1], [], []>} : vector<16x32xbf16>, vector<32x8xbf16>, vector<16x8xf32> -> vector<16x8xf32>
    %23 = vector.broadcast %13 : vector<1x8xf32> to vector<16x8xf32>
    %24 = arith.addf %22, %23 : vector<16x8xf32>
    %c0_19 = arith.constant 0 : index
    %c0_20 = arith.constant 0 : index
    %c0_21 = arith.constant 0 : index
    %c0_22 = arith.constant 0 : index
    %25 = vector.load %arg7[%c0_19, %c0_20, %c0_21, %c0_22] : memref<1x4x32x8xbf16, #tpu.memory_space<vmem>>, vector<1x1x32x8xbf16>
    %26 = vector.shape_cast %25 : vector<1x1x32x8xbf16> to vector<32x8xbf16>
    %cst_23 = arith.constant dense<0.000000e+00> : vector<16x8xf32>
    %27 = tpu.matmul %10, %26, %cst_23 {dimension_numbers = #tpu.dot_dimension_numbers<[1], [0], [0], [1], [0, 0, 1, 1], [], []>} : vector<16x32xbf16>, vector<32x8xbf16>, vector<16x8xf32> -> vector<16x8xf32>
    %28 = vector.broadcast %14 : vector<1x8xf32> to vector<16x8xf32>
    %29 = arith.addf %27, %28 : vector<16x8xf32>
    %30 = vector.shape_cast %19 : vector<16x8xf32> to vector<2x8x8xf32>
    %31 = arith.truncf %30 : vector<2x8x8xf32> to vector<2x8x8xbf16>
    %32 = vector.shape_cast %24 : vector<16x8xf32> to vector<2x8x8xf32>
    %33 = arith.truncf %32 : vector<2x8x8xf32> to vector<2x8x8xbf16>
    %34 = vector.shape_cast %29 : vector<16x8xf32> to vector<2x8x8xf32>
    %35 = arith.truncf %34 : vector<2x8x8xf32> to vector<2x8x8xbf16>
    "tpu.trace_start"() <{level = 10 : i32, message = "bqd,bkd->bqk"}> : () -> ()
    %cst_24 = arith.constant dense<0.000000e+00> : vector<2x8x8xf32>
    %36 = tpu.matmul %31, %33, %cst_24 {dimension_numbers = #tpu.dot_dimension_numbers<[2], [2], [1], [1], [0, 0, 0, 1, 1, 1], [0], [0]>} : vector<2x8x8xbf16>, vector<2x8x8xbf16>, vector<2x8x8xf32> -> vector<2x8x8xf32>
    "tpu.trace_stop"() : () -> ()
    %37 = vector.broadcast %7 : vector<2x1x8xf32> to vector<2x8x8xf32>
    %38 = arith.addf %36, %37 : vector<2x8x8xf32>
    %cst_25 = arith.constant dense<0xFF800000> : vector<2x8xf32>
    %39 = vector.multi_reduction <maximumf>, %38, %cst_25 [2] : vector<2x8x8xf32> to vector<2x8xf32>
    %40 = vector.shape_cast %39 : vector<2x8xf32> to vector<2x8x1xf32>
    %41 = vector.broadcast %40 : vector<2x8x1xf32> to vector<2x8x8xf32>
    %42 = arith.subf %38, %41 : vector<2x8x8xf32>
    %43 = math.exp %42 : vector<2x8x8xf32>
    %cst_26 = arith.constant dense<0.000000e+00> : vector<2x8xf32>
    %44 = vector.multi_reduction <add>, %43, %cst_26 [2] : vector<2x8x8xf32> to vector<2x8xf32>
    %45 = vector.shape_cast %44 : vector<2x8xf32> to vector<2x8x1xf32>
    %46 = tpu.reciprocal %45 {approx = true} : vector<2x8x1xf32> -> vector<2x8x1xf32>
    %47 = vector.broadcast %46 : vector<2x8x1xf32> to vector<2x8x8xf32>
    %48 = arith.mulf %43, %47 : vector<2x8x8xf32>
    %49 = arith.truncf %48 : vector<2x8x8xf32> to vector<2x8x8xbf16>
    "tpu.trace_start"() <{level = 10 : i32, message = "bqk,bkd->bqd"}> : () -> ()
    %cst_27 = arith.constant dense<0.000000e+00> : vector<2x8x8xf32>
    %50 = tpu.matmul %49, %35, %cst_27 {dimension_numbers = #tpu.dot_dimension_numbers<[2], [1], [1], [2], [0, 0, 0, 1, 1, 2], [0], [0]>} : vector<2x8x8xbf16>, vector<2x8x8xbf16>, vector<2x8x8xf32> -> vector<2x8x8xf32>
    "tpu.trace_stop"() : () -> ()
    %51 = vector.shape_cast %50 : vector<2x8x8xf32> to vector<16x8xf32>
    %52 = arith.truncf %51 : vector<16x8xf32> to vector<16x8xbf16>
    %c0_28 = arith.constant 0 : index
    %c0_29 = arith.constant 0 : index
    %c0_30 = arith.constant 0 : index
    %c0_31 = arith.constant 0 : index
    %53 = vector.load %arg8[%c0_28, %c0_29, %c0_30, %c0_31] : memref<1x4x8x32xbf16, #tpu.memory_space<vmem>>, vector<1x1x8x32xbf16>
    %54 = vector.shape_cast %53 : vector<1x1x8x32xbf16> to vector<8x32xbf16>
    %cst_32 = arith.constant dense<0.000000e+00> : vector<16x32xf32>
    %55 = tpu.matmul %52, %54, %cst_32 {dimension_numbers = #tpu.dot_dimension_numbers<[1], [0], [0], [1], [0, 0, 1, 1], [], []>} : vector<16x8xbf16>, vector<8x32xbf16>, vector<16x32xf32> -> vector<16x32xf32>
    %56 = arith.addf %11, %55 : vector<16x32xf32>
    %57 = vector.extract_strided_slice %9 {offsets = [0, 8], sizes = [1, 8], strides = [1, 1]} : vector<10x64xf32> to vector<1x8xf32>
    %58 = vector.extract_strided_slice %9 {offsets = [1, 8], sizes = [1, 8], strides = [1, 1]} : vector<10x64xf32> to vector<1x8xf32>
    %59 = vector.extract_strided_slice %9 {offsets = [2, 8], sizes = [1, 8], strides = [1, 1]} : vector<10x64xf32> to vector<1x8xf32>
    %c0_33 = arith.constant 0 : index
    %c1 = arith.constant 1 : index
    %c0_34 = arith.constant 0 : index
    %c0_35 = arith.constant 0 : index
    %60 = vector.load %arg5[%c0_33, %c1, %c0_34, %c0_35] : memref<1x4x32x8xbf16, #tpu.memory_space<vmem>>, vector<1x1x32x8xbf16>
    %61 = vector.shape_cast %60 : vector<1x1x32x8xbf16> to vector<32x8xbf16>
    %cst_36 = arith.constant dense<0.000000e+00> : vector<16x8xf32>
    %62 = tpu.matmul %10, %61, %cst_36 {dimension_numbers = #tpu.dot_dimension_numbers<[1], [0], [0], [1], [0, 0, 1, 1], [], []>} : vector<16x32xbf16>, vector<32x8xbf16>, vector<16x8xf32> -> vector<16x8xf32>
    %63 = vector.broadcast %57 : vector<1x8xf32> to vector<16x8xf32>
    %64 = arith.addf %62, %63 : vector<16x8xf32>
    %c0_37 = arith.constant 0 : index
    %c1_38 = arith.constant 1 : index
    %c0_39 = arith.constant 0 : index
    %c0_40 = arith.constant 0 : index
    %65 = vector.load %arg6[%c0_37, %c1_38, %c0_39, %c0_40] : memref<1x4x32x8xbf16, #tpu.memory_space<vmem>>, vector<1x1x32x8xbf16>
    %66 = vector.shape_cast %65 : vector<1x1x32x8xbf16> to vector<32x8xbf16>
    %cst_41 = arith.constant dense<0.000000e+00> : vector<16x8xf32>
    %67 = tpu.matmul %10, %66, %cst_41 {dimension_numbers = #tpu.dot_dimension_numbers<[1], [0], [0], [1], [0, 0, 1, 1], [], []>} : vector<16x32xbf16>, vector<32x8xbf16>, vector<16x8xf32> -> vector<16x8xf32>
    %68 = vector.broadcast %58 : vector<1x8xf32> to vector<16x8xf32>
    %69 = arith.addf %67, %68 : vector<16x8xf32>
    %c0_42 = arith.constant 0 : index
    %c1_43 = arith.constant 1 : index
    %c0_44 = arith.constant 0 : index
    %c0_45 = arith.constant 0 : index
    %70 = vector.load %arg7[%c0_42, %c1_43, %c0_44, %c0_45] : memref<1x4x32x8xbf16, #tpu.memory_space<vmem>>, vector<1x1x32x8xbf16>
    %71 = vector.shape_cast %70 : vector<1x1x32x8xbf16> to vector<32x8xbf16>
    %cst_46 = arith.constant dense<0.000000e+00> : vector<16x8xf32>
    %72 = tpu.matmul %10, %71, %cst_46 {dimension_numbers = #tpu.dot_dimension_numbers<[1], [0], [0], [1], [0, 0, 1, 1], [], []>} : vector<16x32xbf16>, vector<32x8xbf16>, vector<16x8xf32> -> vector<16x8xf32>
    %73 = vector.broadcast %59 : vector<1x8xf32> to vector<16x8xf32>
    %74 = arith.addf %72, %73 : vector<16x8xf32>
    %75 = vector.shape_cast %64 : vector<16x8xf32> to vector<2x8x8xf32>
    %76 = arith.truncf %75 : vector<2x8x8xf32> to vector<2x8x8xbf16>
    %77 = vector.shape_cast %69 : vector<16x8xf32> to vector<2x8x8xf32>
    %78 = arith.truncf %77 : vector<2x8x8xf32> to vector<2x8x8xbf16>
    %79 = vector.shape_cast %74 : vector<16x8xf32> to vector<2x8x8xf32>
    %80 = arith.truncf %79 : vector<2x8x8xf32> to vector<2x8x8xbf16>
    "tpu.trace_start"() <{level = 10 : i32, message = "bqd,bkd->bqk"}> : () -> ()
    %cst_47 = arith.constant dense<0.000000e+00> : vector<2x8x8xf32>
    %81 = tpu.matmul %76, %78, %cst_47 {dimension_numbers = #tpu.dot_dimension_numbers<[2], [2], [1], [1], [0, 0, 0, 1, 1, 1], [0], [0]>} : vector<2x8x8xbf16>, vector<2x8x8xbf16>, vector<2x8x8xf32> -> vector<2x8x8xf32>
    "tpu.trace_stop"() : () -> ()
    %82 = vector.broadcast %7 : vector<2x1x8xf32> to vector<2x8x8xf32>
    %83 = arith.addf %81, %82 : vector<2x8x8xf32>
    %cst_48 = arith.constant dense<0xFF800000> : vector<2x8xf32>
    %84 = vector.multi_reduction <maximumf>, %83, %cst_48 [2] : vector<2x8x8xf32> to vector<2x8xf32>
    %85 = vector.shape_cast %84 : vector<2x8xf32> to vector<2x8x1xf32>
    %86 = vector.broadcast %85 : vector<2x8x1xf32> to vector<2x8x8xf32>
    %87 = arith.subf %83, %86 : vector<2x8x8xf32>
    %88 = math.exp %87 : vector<2x8x8xf32>
    %cst_49 = arith.constant dense<0.000000e+00> : vector<2x8xf32>
    %89 = vector.multi_reduction <add>, %88, %cst_49 [2] : vector<2x8x8xf32> to vector<2x8xf32>
    %90 = vector.shape_cast %89 : vector<2x8xf32> to vector<2x8x1xf32>
    %91 = tpu.reciprocal %90 {approx = true} : vector<2x8x1xf32> -> vector<2x8x1xf32>
    %92 = vector.broadcast %91 : vector<2x8x1xf32> to vector<2x8x8xf32>
    %93 = arith.mulf %88, %92 : vector<2x8x8xf32>
    %94 = arith.truncf %93 : vector<2x8x8xf32> to vector<2x8x8xbf16>
    "tpu.trace_start"() <{level = 10 : i32, message = "bqk,bkd->bqd"}> : () -> ()
    %cst_50 = arith.constant dense<0.000000e+00> : vector<2x8x8xf32>
    %95 = tpu.matmul %94, %80, %cst_50 {dimension_numbers = #tpu.dot_dimension_numbers<[2], [1], [1], [2], [0, 0, 0, 1, 1, 2], [0], [0]>} : vector<2x8x8xbf16>, vector<2x8x8xbf16>, vector<2x8x8xf32> -> vector<2x8x8xf32>
    "tpu.trace_stop"() : () -> ()
    %96 = vector.shape_cast %95 : vector<2x8x8xf32> to vector<16x8xf32>
    %97 = arith.truncf %96 : vector<16x8xf32> to vector<16x8xbf16>
    %c0_51 = arith.constant 0 : index
    %c1_52 = arith.constant 1 : index
    %c0_53 = arith.constant 0 : index
    %c0_54 = arith.constant 0 : index
    %98 = vector.load %arg8[%c0_51, %c1_52, %c0_53, %c0_54] : memref<1x4x8x32xbf16, #tpu.memory_space<vmem>>, vector<1x1x8x32xbf16>
    %99 = vector.shape_cast %98 : vector<1x1x8x32xbf16> to vector<8x32xbf16>
    %cst_55 = arith.constant dense<0.000000e+00> : vector<16x32xf32>
    %100 = tpu.matmul %97, %99, %cst_55 {dimension_numbers = #tpu.dot_dimension_numbers<[1], [0], [0], [1], [0, 0, 1, 1], [], []>} : vector<16x8xbf16>, vector<8x32xbf16>, vector<16x32xf32> -> vector<16x32xf32>
    %101 = arith.addf %56, %100 : vector<16x32xf32>
    %102 = vector.extract_strided_slice %9 {offsets = [0, 16], sizes = [1, 8], strides = [1, 1]} : vector<10x64xf32> to vector<1x8xf32>
    %103 = vector.extract_strided_slice %9 {offsets = [1, 16], sizes = [1, 8], strides = [1, 1]} : vector<10x64xf32> to vector<1x8xf32>
    %104 = vector.extract_strided_slice %9 {offsets = [2, 16], sizes = [1, 8], strides = [1, 1]} : vector<10x64xf32> to vector<1x8xf32>
    %c0_56 = arith.constant 0 : index
    %c2 = arith.constant 2 : index
    %c0_57 = arith.constant 0 : index
    %c0_58 = arith.constant 0 : index
    %105 = vector.load %arg5[%c0_56, %c2, %c0_57, %c0_58] : memref<1x4x32x8xbf16, #tpu.memory_space<vmem>>, vector<1x1x32x8xbf16>
    %106 = vector.shape_cast %105 : vector<1x1x32x8xbf16> to vector<32x8xbf16>
    %cst_59 = arith.constant dense<0.000000e+00> : vector<16x8xf32>
    %107 = tpu.matmul %10, %106, %cst_59 {dimension_numbers = #tpu.dot_dimension_numbers<[1], [0], [0], [1], [0, 0, 1, 1], [], []>} : vector<16x32xbf16>, vector<32x8xbf16>, vector<16x8xf32> -> vector<16x8xf32>
    %108 = vector.broadcast %102 : vector<1x8xf32> to vector<16x8xf32>
    %109 = arith.addf %107, %108 : vector<16x8xf32>
    %c0_60 = arith.constant 0 : index
    %c2_61 = arith.constant 2 : index
    %c0_62 = arith.constant 0 : index
    %c0_63 = arith.constant 0 : index
    %110 = vector.load %arg6[%c0_60, %c2_61, %c0_62, %c0_63] : memref<1x4x32x8xbf16, #tpu.memory_space<vmem>>, vector<1x1x32x8xbf16>
    %111 = vector.shape_cast %110 : vector<1x1x32x8xbf16> to vector<32x8xbf16>
    %cst_64 = arith.constant dense<0.000000e+00> : vector<16x8xf32>
    %112 = tpu.matmul %10, %111, %cst_64 {dimension_numbers = #tpu.dot_dimension_numbers<[1], [0], [0], [1], [0, 0, 1, 1], [], []>} : vector<16x32xbf16>, vector<32x8xbf16>, vector<16x8xf32> -> vector<16x8xf32>
    %113 = vector.broadcast %103 : vector<1x8xf32> to vector<16x8xf32>
    %114 = arith.addf %112, %113 : vector<16x8xf32>
    %c0_65 = arith.constant 0 : index
    %c2_66 = arith.constant 2 : index
    %c0_67 = arith.constant 0 : index
    %c0_68 = arith.constant 0 : index
    %115 = vector.load %arg7[%c0_65, %c2_66, %c0_67, %c0_68] : memref<1x4x32x8xbf16, #tpu.memory_space<vmem>>, vector<1x1x32x8xbf16>
    %116 = vector.shape_cast %115 : vector<1x1x32x8xbf16> to vector<32x8xbf16>
    %cst_69 = arith.constant dense<0.000000e+00> : vector<16x8xf32>
    %117 = tpu.matmul %10, %116, %cst_69 {dimension_numbers = #tpu.dot_dimension_numbers<[1], [0], [0], [1], [0, 0, 1, 1], [], []>} : vector<16x32xbf16>, vector<32x8xbf16>, vector<16x8xf32> -> vector<16x8xf32>
    %118 = vector.broadcast %104 : vector<1x8xf32> to vector<16x8xf32>
    %119 = arith.addf %117, %118 : vector<16x8xf32>
    %120 = vector.shape_cast %109 : vector<16x8xf32> to vector<2x8x8xf32>
    %121 = arith.truncf %120 : vector<2x8x8xf32> to vector<2x8x8xbf16>
    %122 = vector.shape_cast %114 : vector<16x8xf32> to vector<2x8x8xf32>
    %123 = arith.truncf %122 : vector<2x8x8xf32> to vector<2x8x8xbf16>
    %124 = vector.shape_cast %119 : vector<16x8xf32> to vector<2x8x8xf32>
    %125 = arith.truncf %124 : vector<2x8x8xf32> to vector<2x8x8xbf16>
    "tpu.trace_start"() <{level = 10 : i32, message = "bqd,bkd->bqk"}> : () -> ()
    %cst_70 = arith.constant dense<0.000000e+00> : vector<2x8x8xf32>
    %126 = tpu.matmul %121, %123, %cst_70 {dimension_numbers = #tpu.dot_dimension_numbers<[2], [2], [1], [1], [0, 0, 0, 1, 1, 1], [0], [0]>} : vector<2x8x8xbf16>, vector<2x8x8xbf16>, vector<2x8x8xf32> -> vector<2x8x8xf32>
    "tpu.trace_stop"() : () -> ()
    %127 = vector.broadcast %7 : vector<2x1x8xf32> to vector<2x8x8xf32>
    %128 = arith.addf %126, %127 : vector<2x8x8xf32>
    %cst_71 = arith.constant dense<0xFF800000> : vector<2x8xf32>
    %129 = vector.multi_reduction <maximumf>, %128, %cst_71 [2] : vector<2x8x8xf32> to vector<2x8xf32>
    %130 = vector.shape_cast %129 : vector<2x8xf32> to vector<2x8x1xf32>
    %131 = vector.broadcast %130 : vector<2x8x1xf32> to vector<2x8x8xf32>
    %132 = arith.subf %128, %131 : vector<2x8x8xf32>
    %133 = math.exp %132 : vector<2x8x8xf32>
    %cst_72 = arith.constant dense<0.000000e+00> : vector<2x8xf32>
    %134 = vector.multi_reduction <add>, %133, %cst_72 [2] : vector<2x8x8xf32> to vector<2x8xf32>
    %135 = vector.shape_cast %134 : vector<2x8xf32> to vector<2x8x1xf32>
    %136 = tpu.reciprocal %135 {approx = true} : vector<2x8x1xf32> -> vector<2x8x1xf32>
    %137 = vector.broadcast %136 : vector<2x8x1xf32> to vector<2x8x8xf32>
    %138 = arith.mulf %133, %137 : vector<2x8x8xf32>
    %139 = arith.truncf %138 : vector<2x8x8xf32> to vector<2x8x8xbf16>
    "tpu.trace_start"() <{level = 10 : i32, message = "bqk,bkd->bqd"}> : () -> ()
    %cst_73 = arith.constant dense<0.000000e+00> : vector<2x8x8xf32>
    %140 = tpu.matmul %139, %125, %cst_73 {dimension_numbers = #tpu.dot_dimension_numbers<[2], [1], [1], [2], [0, 0, 0, 1, 1, 2], [0], [0]>} : vector<2x8x8xbf16>, vector<2x8x8xbf16>, vector<2x8x8xf32> -> vector<2x8x8xf32>
    "tpu.trace_stop"() : () -> ()
    %141 = vector.shape_cast %140 : vector<2x8x8xf32> to vector<16x8xf32>
    %142 = arith.truncf %141 : vector<16x8xf32> to vector<16x8xbf16>
    %c0_74 = arith.constant 0 : index
    %c2_75 = arith.constant 2 : index
    %c0_76 = arith.constant 0 : index
    %c0_77 = arith.constant 0 : index
    %143 = vector.load %arg8[%c0_74, %c2_75, %c0_76, %c0_77] : memref<1x4x8x32xbf16, #tpu.memory_space<vmem>>, vector<1x1x8x32xbf16>
    %144 = vector.shape_cast %143 : vector<1x1x8x32xbf16> to vector<8x32xbf16>
    %cst_78 = arith.constant dense<0.000000e+00> : vector<16x32xf32>
    %145 = tpu.matmul %142, %144, %cst_78 {dimension_numbers = #tpu.dot_dimension_numbers<[1], [0], [0], [1], [0, 0, 1, 1], [], []>} : vector<16x8xbf16>, vector<8x32xbf16>, vector<16x32xf32> -> vector<16x32xf32>
    %146 = arith.addf %101, %145 : vector<16x32xf32>
    %147 = vector.extract_strided_slice %9 {offsets = [0, 24], sizes = [1, 8], strides = [1, 1]} : vector<10x64xf32> to vector<1x8xf32>
    %148 = vector.extract_strided_slice %9 {offsets = [1, 24], sizes = [1, 8], strides = [1, 1]} : vector<10x64xf32> to vector<1x8xf32>
    %149 = vector.extract_strided_slice %9 {offsets = [2, 24], sizes = [1, 8], strides = [1, 1]} : vector<10x64xf32> to vector<1x8xf32>
    %c0_79 = arith.constant 0 : index
    %c3 = arith.constant 3 : index
    %c0_80 = arith.constant 0 : index
    %c0_81 = arith.constant 0 : index
    %150 = vector.load %arg5[%c0_79, %c3, %c0_80, %c0_81] : memref<1x4x32x8xbf16, #tpu.memory_space<vmem>>, vector<1x1x32x8xbf16>
    %151 = vector.shape_cast %150 : vector<1x1x32x8xbf16> to vector<32x8xbf16>
    %cst_82 = arith.constant dense<0.000000e+00> : vector<16x8xf32>
    %152 = tpu.matmul %10, %151, %cst_82 {dimension_numbers = #tpu.dot_dimension_numbers<[1], [0], [0], [1], [0, 0, 1, 1], [], []>} : vector<16x32xbf16>, vector<32x8xbf16>, vector<16x8xf32> -> vector<16x8xf32>
    %153 = vector.broadcast %147 : vector<1x8xf32> to vector<16x8xf32>
    %154 = arith.addf %152, %153 : vector<16x8xf32>
    %c0_83 = arith.constant 0 : index
    %c3_84 = arith.constant 3 : index
    %c0_85 = arith.constant 0 : index
    %c0_86 = arith.constant 0 : index
    %155 = vector.load %arg6[%c0_83, %c3_84, %c0_85, %c0_86] : memref<1x4x32x8xbf16, #tpu.memory_space<vmem>>, vector<1x1x32x8xbf16>
    %156 = vector.shape_cast %155 : vector<1x1x32x8xbf16> to vector<32x8xbf16>
    %cst_87 = arith.constant dense<0.000000e+00> : vector<16x8xf32>
    %157 = tpu.matmul %10, %156, %cst_87 {dimension_numbers = #tpu.dot_dimension_numbers<[1], [0], [0], [1], [0, 0, 1, 1], [], []>} : vector<16x32xbf16>, vector<32x8xbf16>, vector<16x8xf32> -> vector<16x8xf32>
    %158 = vector.broadcast %148 : vector<1x8xf32> to vector<16x8xf32>
    %159 = arith.addf %157, %158 : vector<16x8xf32>
    %c0_88 = arith.constant 0 : index
    %c3_89 = arith.constant 3 : index
    %c0_90 = arith.constant 0 : index
    %c0_91 = arith.constant 0 : index
    %160 = vector.load %arg7[%c0_88, %c3_89, %c0_90, %c0_91] : memref<1x4x32x8xbf16, #tpu.memory_space<vmem>>, vector<1x1x32x8xbf16>
    %161 = vector.shape_cast %160 : vector<1x1x32x8xbf16> to vector<32x8xbf16>
    %cst_92 = arith.constant dense<0.000000e+00> : vector<16x8xf32>
    %162 = tpu.matmul %10, %161, %cst_92 {dimension_numbers = #tpu.dot_dimension_numbers<[1], [0], [0], [1], [0, 0, 1, 1], [], []>} : vector<16x32xbf16>, vector<32x8xbf16>, vector<16x8xf32> -> vector<16x8xf32>
    %163 = vector.broadcast %149 : vector<1x8xf32> to vector<16x8xf32>
    %164 = arith.addf %162, %163 : vector<16x8xf32>
    %165 = vector.shape_cast %154 : vector<16x8xf32> to vector<2x8x8xf32>
    %166 = arith.truncf %165 : vector<2x8x8xf32> to vector<2x8x8xbf16>
    %167 = vector.shape_cast %159 : vector<16x8xf32> to vector<2x8x8xf32>
    %168 = arith.truncf %167 : vector<2x8x8xf32> to vector<2x8x8xbf16>
    %169 = vector.shape_cast %164 : vector<16x8xf32> to vector<2x8x8xf32>
    %170 = arith.truncf %169 : vector<2x8x8xf32> to vector<2x8x8xbf16>
    "tpu.trace_start"() <{level = 10 : i32, message = "bqd,bkd->bqk"}> : () -> ()
    %cst_93 = arith.constant dense<0.000000e+00> : vector<2x8x8xf32>
    %171 = tpu.matmul %166, %168, %cst_93 {dimension_numbers = #tpu.dot_dimension_numbers<[2], [2], [1], [1], [0, 0, 0, 1, 1, 1], [0], [0]>} : vector<2x8x8xbf16>, vector<2x8x8xbf16>, vector<2x8x8xf32> -> vector<2x8x8xf32>
    "tpu.trace_stop"() : () -> ()
    %172 = vector.broadcast %7 : vector<2x1x8xf32> to vector<2x8x8xf32>
    %173 = arith.addf %171, %172 : vector<2x8x8xf32>
    %cst_94 = arith.constant dense<0xFF800000> : vector<2x8xf32>
    %174 = vector.multi_reduction <maximumf>, %173, %cst_94 [2] : vector<2x8x8xf32> to vector<2x8xf32>
    %175 = vector.shape_cast %174 : vector<2x8xf32> to vector<2x8x1xf32>
    %176 = vector.broadcast %175 : vector<2x8x1xf32> to vector<2x8x8xf32>
    %177 = arith.subf %173, %176 : vector<2x8x8xf32>
    %178 = math.exp %177 : vector<2x8x8xf32>
    %cst_95 = arith.constant dense<0.000000e+00> : vector<2x8xf32>
    %179 = vector.multi_reduction <add>, %178, %cst_95 [2] : vector<2x8x8xf32> to vector<2x8xf32>
    %180 = vector.shape_cast %179 : vector<2x8xf32> to vector<2x8x1xf32>
    %181 = tpu.reciprocal %180 {approx = true} : vector<2x8x1xf32> -> vector<2x8x1xf32>
    %182 = vector.broadcast %181 : vector<2x8x1xf32> to vector<2x8x8xf32>
    %183 = arith.mulf %178, %182 : vector<2x8x8xf32>
    %184 = arith.truncf %183 : vector<2x8x8xf32> to vector<2x8x8xbf16>
    "tpu.trace_start"() <{level = 10 : i32, message = "bqk,bkd->bqd"}> : () -> ()
    %cst_96 = arith.constant dense<0.000000e+00> : vector<2x8x8xf32>
    %185 = tpu.matmul %184, %170, %cst_96 {dimension_numbers = #tpu.dot_dimension_numbers<[2], [1], [1], [2], [0, 0, 0, 1, 1, 2], [0], [0]>} : vector<2x8x8xbf16>, vector<2x8x8xbf16>, vector<2x8x8xf32> -> vector<2x8x8xf32>
    "tpu.trace_stop"() : () -> ()
    %186 = vector.shape_cast %185 : vector<2x8x8xf32> to vector<16x8xf32>
    %187 = arith.truncf %186 : vector<16x8xf32> to vector<16x8xbf16>
    %c0_97 = arith.constant 0 : index
    %c3_98 = arith.constant 3 : index
    %c0_99 = arith.constant 0 : index
    %c0_100 = arith.constant 0 : index
    %188 = vector.load %arg8[%c0_97, %c3_98, %c0_99, %c0_100] : memref<1x4x8x32xbf16, #tpu.memory_space<vmem>>, vector<1x1x8x32xbf16>
    %189 = vector.shape_cast %188 : vector<1x1x8x32xbf16> to vector<8x32xbf16>
    %cst_101 = arith.constant dense<0.000000e+00> : vector<16x32xf32>
    %190 = tpu.matmul %187, %189, %cst_101 {dimension_numbers = #tpu.dot_dimension_numbers<[1], [0], [0], [1], [0, 0, 1, 1], [], []>} : vector<16x8xbf16>, vector<8x32xbf16>, vector<16x32xf32> -> vector<16x32xf32>
    %191 = arith.addf %146, %190 : vector<16x32xf32>
    %192 = vector.extract_strided_slice %9 {offsets = [3, 0], sizes = [1, 32], strides = [1, 1]} : vector<10x64xf32> to vector<1x32xf32>
    %193 = vector.broadcast %192 : vector<1x32xf32> to vector<16x32xf32>
    %194 = arith.addf %191, %193 : vector<16x32xf32>
    %195 = arith.addf %4, %194 : vector<16x32xf32>
    %196 = vector.extract_strided_slice %9 {offsets = [4, 0], sizes = [1, 32], strides = [1, 1]} : vector<10x64xf32> to vector<1x32xf32>
    %197 = vector.extract_strided_slice %9 {offsets = [5, 0], sizes = [1, 32], strides = [1, 1]} : vector<10x64xf32> to vector<1x32xf32>
    %cst_102 = arith.constant dense<0.000000e+00> : vector<16xf32>
    %198 = vector.multi_reduction <add>, %195, %cst_102 [1] : vector<16x32xf32> to vector<16xf32>
    %199 = vector.shape_cast %198 : vector<16xf32> to vector<16x1xf32>
    %cst_103 = arith.constant 3.200000e+01 : f32
    %200 = vector.broadcast %cst_103 : f32 to vector<16x1xf32>
    %201 = arith.divf %199, %200 : vector<16x1xf32>
    %202 = vector.broadcast %201 : vector<16x1xf32> to vector<16x32xf32>
    %203 = arith.subf %195, %202 : vector<16x32xf32>
    %204 = arith.mulf %203, %203 : vector<16x32xf32>
    %cst_104 = arith.constant dense<0.000000e+00> : vector<16xf32>
    %205 = vector.multi_reduction <add>, %204, %cst_104 [1] : vector<16x32xf32> to vector<16xf32>
    %206 = vector.shape_cast %205 : vector<16xf32> to vector<16x1xf32>
    %cst_105 = arith.constant 3.200000e+01 : f32
    %207 = vector.broadcast %cst_105 : f32 to vector<16x1xf32>
    %208 = arith.divf %206, %207 : vector<16x1xf32>
    %209 = vector.broadcast %201 : vector<16x1xf32> to vector<16x32xf32>
    %210 = arith.subf %195, %209 : vector<16x32xf32>
    %cst_106 = arith.constant 9.99999974E-6 : f32
    %211 = vector.broadcast %cst_106 : f32 to vector<16x1xf32>
    %212 = arith.addf %208, %211 : vector<16x1xf32>
    %213 = math.rsqrt %212 : vector<16x1xf32>
    %214 = vector.broadcast %213 : vector<16x1xf32> to vector<16x32xf32>
    %215 = arith.mulf %210, %214 : vector<16x32xf32>
    %216 = vector.broadcast %196 : vector<1x32xf32> to vector<16x32xf32>
    %217 = arith.mulf %215, %216 : vector<16x32xf32>
    %218 = vector.broadcast %197 : vector<1x32xf32> to vector<16x32xf32>
    %219 = arith.addf %217, %218 : vector<16x32xf32>
    %220 = arith.truncf %219 : vector<16x32xf32> to vector<16x32xbf16>
    %c0_107 = arith.constant 0 : index
    %c0_108 = arith.constant 0 : index
    %c0_109 = arith.constant 0 : index
    %221 = vector.load %arg9[%c0_107, %c0_108, %c0_109] : memref<1x32x64xbf16, #tpu.memory_space<vmem>>, vector<1x32x64xbf16>
    %222 = vector.shape_cast %221 : vector<1x32x64xbf16> to vector<32x64xbf16>
    %cst_110 = arith.constant dense<0.000000e+00> : vector<16x64xf32>
    %223 = tpu.matmul %220, %222, %cst_110 {dimension_numbers = #tpu.dot_dimension_numbers<[1], [0], [0], [1], [0, 0, 1, 1], [], []>} : vector<16x32xbf16>, vector<32x64xbf16>, vector<16x64xf32> -> vector<16x64xf32>
    %224 = vector.extract_strided_slice %9 {offsets = [6, 0], sizes = [1, 64], strides = [1, 1]} : vector<10x64xf32> to vector<1x64xf32>
    %225 = vector.broadcast %224 : vector<1x64xf32> to vector<16x64xf32>
    %226 = arith.addf %223, %225 : vector<16x64xf32>
    %cst_111 = arith.constant 0.000000e+00 : f32
    %227 = vector.broadcast %cst_111 : f32 to vector<16x64xf32>
    %228 = arith.maximumf %226, %227 : vector<16x64xf32>
    %229 = arith.truncf %228 : vector<16x64xf32> to vector<16x64xbf16>
    %c0_112 = arith.constant 0 : index
    %c0_113 = arith.constant 0 : index
    %c0_114 = arith.constant 0 : index
    %230 = vector.load %arg10[%c0_112, %c0_113, %c0_114] : memref<1x64x32xbf16, #tpu.memory_space<vmem>>, vector<1x64x32xbf16>
    %231 = vector.shape_cast %230 : vector<1x64x32xbf16> to vector<64x32xbf16>
    %cst_115 = arith.constant dense<0.000000e+00> : vector<16x32xf32>
    %232 = tpu.matmul %229, %231, %cst_115 {dimension_numbers = #tpu.dot_dimension_numbers<[1], [0], [0], [1], [0, 0, 1, 1], [], []>} : vector<16x64xbf16>, vector<64x32xbf16>, vector<16x32xf32> -> vector<16x32xf32>
    %233 = vector.extract_strided_slice %9 {offsets = [7, 0], sizes = [1, 32], strides = [1, 1]} : vector<10x64xf32> to vector<1x32xf32>
    %234 = vector.broadcast %233 : vector<1x32xf32> to vector<16x32xf32>
    %235 = arith.addf %232, %234 : vector<16x32xf32>
    %236 = arith.addf %219, %235 : vector<16x32xf32>
    %237 = vector.extract_strided_slice %9 {offsets = [8, 0], sizes = [1, 32], strides = [1, 1]} : vector<10x64xf32> to vector<1x32xf32>
    %238 = vector.extract_strided_slice %9 {offsets = [9, 0], sizes = [1, 32], strides = [1, 1]} : vector<10x64xf32> to vector<1x32xf32>
    %cst_116 = arith.constant dense<0.000000e+00> : vector<16xf32>
    %239 = vector.multi_reduction <add>, %236, %cst_116 [1] : vector<16x32xf32> to vector<16xf32>
    %240 = vector.shape_cast %239 : vector<16xf32> to vector<16x1xf32>
    %cst_117 = arith.constant 3.200000e+01 : f32
    %241 = vector.broadcast %cst_117 : f32 to vector<16x1xf32>
    %242 = arith.divf %240, %241 : vector<16x1xf32>
    %243 = vector.broadcast %242 : vector<16x1xf32> to vector<16x32xf32>
    %244 = arith.subf %236, %243 : vector<16x32xf32>
    %245 = arith.mulf %244, %244 : vector<16x32xf32>
    %cst_118 = arith.constant dense<0.000000e+00> : vector<16xf32>
    %246 = vector.multi_reduction <add>, %245, %cst_118 [1] : vector<16x32xf32> to vector<16xf32>
    %247 = vector.shape_cast %246 : vector<16xf32> to vector<16x1xf32>
    %cst_119 = arith.constant 3.200000e+01 : f32
    %248 = vector.broadcast %cst_119 : f32 to vector<16x1xf32>
    %249 = arith.divf %247, %248 : vector<16x1xf32>
    %250 = vector.broadcast %242 : vector<16x1xf32> to vector<16x32xf32>
    %251 = arith.subf %236, %250 : vector<16x32xf32>
    %cst_120 = arith.constant 9.99999974E-6 : f32
    %252 = vector.broadcast %cst_120 : f32 to vector<16x1xf32>
    %253 = arith.addf %249, %252 : vector<16x1xf32>
    %254 = math.rsqrt %253 : vector<16x1xf32>
    %255 = vector.broadcast %254 : vector<16x1xf32> to vector<16x32xf32>
    %256 = arith.mulf %251, %255 : vector<16x32xf32>
    %257 = vector.broadcast %237 : vector<1x32xf32> to vector<16x32xf32>
    %258 = arith.mulf %256, %257 : vector<16x32xf32>
    %259 = vector.broadcast %238 : vector<1x32xf32> to vector<16x32xf32>
    %260 = arith.addf %258, %259 : vector<16x32xf32>
    %c0_121 = arith.constant 0 : index
    %c0_122 = arith.constant 0 : index
    %c0_123 = arith.constant 0 : index
    %261 = vector.load %arg11[%c0_121, %c0_122, %c0_123] : memref<1x16x32xf32, #tpu.memory_space<vmem>>, vector<1x16x32xf32>
    %262 = vector.shape_cast %261 : vector<1x16x32xf32> to vector<16x32xf32>
    %263 = vector.shape_cast %260 : vector<16x32xf32> to vector<1x16x32xf32>
    tpu.vector_store %arg11[%c0_121, %c0_122, %c0_123], %263 {strides = array<i32>} : memref<1x16x32xf32, #tpu.memory_space<vmem>>, vector<1x16x32xf32>,
    return
  }
  func.func @transform_0(%arg0: i32, %arg1: i32) -> (i32, i32, i32) {
    %c0_i32 = arith.constant 0 : i32
    %c0_i32_0 = arith.constant 0 : i32
    %c0_i32_1 = arith.constant 0 : i32
    return %arg0, %c0_i32, %c0_i32_0 : i32, i32, i32
  }
  func.func @transform_1(%arg0: i32, %arg1: i32) -> (i32, i32, i32) {
    %c0_i32 = arith.constant 0 : i32
    %c0_i32_0 = arith.constant 0 : i32
    %c0_i32_1 = arith.constant 0 : i32
    return %arg0, %c0_i32, %c0_i32_0 : i32, i32, i32
  }
  func.func @transform_2(%arg0: i32, %arg1: i32) -> (i32, i32, i32) {
    %c0_i32 = arith.constant 0 : i32
    %c0_i32_0 = arith.constant 0 : i32
    %c0_i32_1 = arith.constant 0 : i32
    return %arg1, %c0_i32, %c0_i32_0 : i32, i32, i32
  }
  func.func @transform_3(%arg0: i32, %arg1: i32) -> (i32, i32, i32, i32) {
    %c0_i32 = arith.constant 0 : i32
    %c0_i32_0 = arith.constant 0 : i32
    %c0_i32_1 = arith.constant 0 : i32
    %c0_i32_2 = arith.constant 0 : i32
    return %arg1, %c0_i32, %c0_i32_0, %c0_i32_1 : i32, i32, i32, i32
  }
  func.func @transform_4(%arg0: i32, %arg1: i32) -> (i32, i32, i32, i32) {
    %c0_i32 = arith.constant 0 : i32
    %c0_i32_0 = arith.constant 0 : i32
    %c0_i32_1 = arith.constant 0 : i32
    %c0_i32_2 = arith.constant 0 : i32
    return %arg1, %c0_i32, %c0_i32_0, %c0_i32_1 : i32, i32, i32, i32
  }
  func.func @transform_5(%arg0: i32, %arg1: i32) -> (i32, i32, i32, i32) {
    %c0_i32 = arith.constant 0 : i32
    %c0_i32_0 = arith.constant 0 : i32
    %c0_i32_1 = arith.constant 0 : i32
    %c0_i32_2 = arith.constant 0 : i32
    return %arg1, %c0_i32, %c0_i32_0, %c0_i32_1 : i32, i32, i32, i32
  }
  func.func @transform_6(%arg0: i32, %arg1: i32) -> (i32, i32, i32, i32) {
    %c0_i32 = arith.constant 0 : i32
    %c0_i32_0 = arith.constant 0 : i32
    %c0_i32_1 = arith.constant 0 : i32
    %c0_i32_2 = arith.constant 0 : i32
    return %arg1, %c0_i32, %c0_i32_0, %c0_i32_1 : i32, i32, i32, i32
  }
  func.func @transform_7(%arg0: i32, %arg1: i32) -> (i32, i32, i32) {
    %c0_i32 = arith.constant 0 : i32
    %c0_i32_0 = arith.constant 0 : i32
    %c0_i32_1 = arith.constant 0 : i32
    return %arg1, %c0_i32, %c0_i32_0 : i32, i32, i32
  }
  func.func @transform_8(%arg0: i32, %arg1: i32) -> (i32, i32, i32) {
    %c0_i32 = arith.constant 0 : i32
    %c0_i32_0 = arith.constant 0 : i32
    %c0_i32_1 = arith.constant 0 : i32
    return %arg1, %c0_i32, %c0_i32_0 : i32, i32, i32
  }
  func.func @transform_9(%arg0: i32, %arg1: i32) -> (i32, i32, i32) {
    %c0_i32 = arith.constant 0 : i32
    %c0_i32_0 = arith.constant 0 : i32
    %c0_i32_1 = arith.constant 0 : i32
    return %arg0, %c0_i32, %c0_i32_0 : i32, i32, i32
  }
}

</mosaic_0001>

<bundles_post_ra>
// kernel: tpu_custom_call.1
= control target key start
LH: loop header
LB: loop body
LE: loop exit
PB: predicated region body
PF: predicated region fallthrough
CT: control target
= control target key end

     0   :  { %s3864_s0 = inlined_call_operand.vmem [shape: f32[1,16,32], index: 0, kind: input, shape index: {}]   ;;  %s3865_s1 = inlined_call_operand.vmem [shape: f32[1,2,8], index: 1, kind: input, shape index: {}]   ;;  %s3866_s2 = inlined_call_operand.vmem [shape: f32[2,10,64], index: 2, kind: input, shape index: {}]   ;;  %s3867_s3 = inlined_call_operand.vmem [shape: bf16[2,4,32,8], index: 3, kind: input, shape index: {}]   ;;  %s3868_s4 = inlined_call_operand.vmem [shape: bf16[2,4,32,8], index: 4, kind: input, shape index: {}]   ;;  %s3869_s5 = inlined_call_operand.vmem [shape: bf16[2,4,32,8], index: 5, kind: input, shape index: {}]   ;;  %s3870_s6 = inlined_call_operand.vmem [shape: bf16[2,4,8,32], index: 6, kind: input, shape index: {}]   ;;  %s3871_s7 = inlined_call_operand.vmem [shape: bf16[2,32,64], index: 7, kind: input, shape index: {}]   ;;  %s3872_s8 = inlined_call_operand.vmem [shape: bf16[2,64,32], index: 8, kind: input, shape index: {}]   ;;  %s3873_s9 = inlined_call_operand.hbm [shape: f32[1,16,32], index: 9, kind: output, shape index: {}]  }
   0x1   :  { %3874 = sst [smem:[#allocation5_spill]] %s3866_s2 }
   0x2   :  { %3875 = sst [smem:[#allocation6_spill]] %s3867_s3 }
   0x3   :  { %14 = vsyncpa [#allocation3], 0  ;;  %s3425_s30 = smov 0   ;;  %s3427_s10 = smov 0  }
   0x4   :  { %s3429_s11 = smov 0  }
   0x5 LB: > { %s29_s13 = sadd.s32 1, %s3360_s10  ;;  %p2749_p1 = scmp.ge.s32.totalorder %s3364_s11, 1  ;;  %s3364_s11 = sphi %s3429_s11, %s20_s11   ;;  %s3360_s10 = sphi %s3427_s10, %s3881_s10   ;;  %s3356_s30 = sphi %s3425_s30, %s3880_s30  }
   0x6   : > { %p30_p0 = scmp.ge.s32.totalorder %s29_s13, 2  ;;  %p379_p2 = scmp.lt.s32.totalorder %s3364_s11, 3 }
   0x8   : > { %s3883_s13 = smov (%p30_p0, %s29_s13), 0  ;;  %p380_p3 = pnand %p2749_p1, %p379_p2 }
   0x9   : > { %p458_p4 = scmp.lt.s32.totalorder (!%p380_p3), %s3356_s30, 1  ;;  %s3876_s2 = sld [smem:[#allocation5_spill]] (!%p380_p3) }
   0xa   : > { %383 = sbr.rel (%p380_p3) target bundleno = 5024 (0x13a0), region = 56  ;;  %s3877_s3 = sld [smem:[#allocation6_spill]] (!%p380_p3) }
   0xb   : > { %p2764_p5 = scmp.ne.s32.totalorder (!%p380_p3), %s3356_s30, 0 }
  0x11   : > { %s459_s14 = scalar_select %p458_p4, %s3356_s30, 1 }
  0x12   : > { %497 = sbr.rel (%p2764_p5) target bundleno = 25 (0x19), region = 60  ;;  %v498_v0 = vld [vmem:[%s3864_s0] sm:$0xff] (!%p2764_p5)  ;;  %vm500_vm0 = vcmask (!%p2764_p5), 261120   ;;  %v499_v1 = vld [vmem:[%s3864_s0 + $0x8] sm:$0xff] (!%p2764_p5) }
  0x13   : > { %s2873_s15 = sshll.u32 %s459_s14, 4  ;;  %s2874_s16 = sshll.u32 %s459_s14, 6  ;;  %501 = vst.msk [vmem:[#allocation2] sm:$0xff] (!%p2764_p5), %vm500_vm0, %v498_v0  ;;  %502 = vst.msk [vmem:[#allocation2 + $0x8] sm:$0xff] (!%p2764_p5), %vm500_vm0, %v499_v1 }
  0x14   : > { %s3447_s19 = scalar_lea.vmem %s3876_s2, %s2873_s15  ;;  %s3452_s22 = scalar_lea.vmem %s3877_s3, %s2874_s16 }
  0x15   : > { %s3457_s25 = scalar_lea.vmem %s3868_s4, %s2874_s16  ;;  %s3462_s28 = scalar_lea.vmem %s3869_s5, %s2874_s16 }
  0x16   : > { %s3467_s17 = scalar_lea.vmem %s3870_s6, %s2873_s15  ;;  %s3472_s20 = scalar_lea.vmem %s3871_s7, %s2873_s15 }
  0x17   : > { %s2879_s21 = sshll.u32 %s459_s14, 5 }
  0x18   : > { %s3477_s24 = scalar_lea.vmem %s3872_s8, %s2879_s21 }
  0x19 PF: > { %v3239_v2 = vld [vmem:[%s3457_s25] sm:$0xff]   ;;  %v3366_v3 = vmov 0.0   ;;  %v3240_v4 = vld [vmem:[%s3457_s25 + $0x8] sm:$0xff]   ;;  %vm3367_vm1 = vmmov 0   ;;  %vm552_vm2 = vcmask 261120   ;;  %v518_v12 = vlaneseq  ;;  %s3369_s30 = smov 120  }
  0x1a   : > { %2972 = vmatprep.subr.bf16.mxu1 %v3366_v3  ;;  %2964 = vmatprep.subr.bf16.mxu0 %v3366_v3  ;;  %v3241_v5 = vld [vmem:[%s3452_s22] sm:$0xff]   ;;  %v504_v7 = vld [vmem:[#allocation2 + $0x8] sm:$0xff]  ;;  %vm735_vm3 = vcmask 64512   ;;  %vm855_vm4 = vcmask 1043456   ;;  %v3368_v49 = vmov 1966171168  }
  0x1b   : > { %2973 = vmatpush3.bf16.msra.mxu1 %v3239_v2  ;;  %2976 = vmatprep.mubr.msk.bf16.mxu1 %vm3367_vm1, %v3366_v3  ;;  %v503_v6 = vld [vmem:[#allocation2] sm:$0xff]  ;;  %v3242_v8 = vld [vmem:[%s3452_s22 + $0x8] sm:$0xff]   ;;  %v3517_v13 = vshrl.u32 %v518_v12, 7  ;;  %v516_v50 = vunpack.c.l.s4 %v3368_v49  ;;  %s3370_s14 = smov 112   ;;  %s3371_s15 = smov 104   ;;  %vm2493_vm5 = vcmask 523264  }
  0x1c   : > { %2974 = vmatprep.subr.bf16.mxu1 %v3366_v3  ;;  %2968 = vmatprep.mubr.msk.bf16.mxu0 %vm3367_vm1, %v3366_v3  ;;  %v3496_v9 = vpack.c.bf16 %v504_v7, %v503_v6  ;;  %v3243_v10 = vld [vmem:[%s3462_s28] sm:$0xff]   ;;  %v3244_v11 = vld [vmem:[%s3462_s28 + $0x8] sm:$0xff]  }
  0x1d   : > { %2965 = vmatpush3.bf16.msra.mxu0 %v3241_v5  ;;  %v603_v14 = vsub.s32 1, %v3517_v13  ;;  %v529_v15 = vld [vmem:[%s3447_s19] sm:$0xff]  ;;  %v3526_v17 = vsub.s32 0, %v3517_v13  ;;  %v664_v28 = vsub.s32 2, %v3517_v13  ;;  %v517_v52 = vunpack.c.0.s8 %v516_v50 }
  0x1e   : > { %2966 = vmatprep.subr.bf16.mxu0 %v3366_v3  ;;  %v2765_v51 = vld.sshfl [vmem:[%s3865_s1] sm:$0x11 pattern:$0x75316420] }
  0x1f   : > { %2975 = vmatpush3.bf16.msra.mxu1 %v3240_v4  ;;  %v3523_v16 = vrot.slane %v529_v15, %v603_v14  ;;  %v3530_v21 = vrot.slane %v529_v15, %v3526_v17  ;;  %v3537_v35 = vrot.slane %v529_v15, %v664_v28  ;;  %v514_v53 = vcombine.high %v2765_v51, %v2765_v51  ;;  %v3245_v28 = vld [vmem:[%s3457_s25 + $0x10] sm:$0xff]  }
  0x20   : > { %2988 = vmatprep.subr.bf16.mxu1 %v3366_v3  ;;  %v520_v54 = vsub.s32 %v517_v52, %v3517_v13 }
  0x21   : > { %2967 = vmatpush3.bf16.msra.mxu0 %v3242_v8 }
  0x22   : > { %2977 = vmatmul.mubr.msk.bf16.vlgmr.msra.gmra.mrb[0].mxu1 %vm552_vm2, %v3496_v9  ;;  %2980 = vmatprep.subr.bf16.mxu0 %v3366_v3  ;;  %v528_v55 = vrot.slane %v514_v53, %v520_v54  ;;  %v521_v56 = vrot.slane %v2765_v51, %v520_v54 }
  0x23   : > { %2990 = vmatprep.mubr.msk.bf16.mxu1 %vm3367_vm1, %v3366_v3 }
  0x24   : > { %2969 = vmatmul.mubr.msk.bf16.vlgmr.msra.gmra.mrb[0].mxu0 %vm552_vm2, %v3496_v9  ;;  %v3559_v57 = vrot.slane %v528_v55, %v3526_v17  ;;  %v3562_v59 = vrot.slane %v521_v56, %v3526_v17 }
  0x25   : > { %2981 = vmatpush3.bf16.msra.mxu0 %v3243_v10  ;;  %2984 = vmatprep.mubr.msk.bf16.mxu0 %vm3367_vm1, %v3366_v3 }
  0x26   : > { %2982 = vmatprep.subr.bf16.mxu0 %v3366_v3 }
  0x29   : > { %2983 = vmatpush3.bf16.msra.mxu0 %v3244_v11 }
  0x2a   : > { %2994 = vmatprep.subr.bf16.mxu0 %v3366_v3 }
  0x2c   : > { %2985 = vmatmul.mubr.msk.bf16.vlgmr.msra.gmra.mrb[4].mxu0 %vm552_vm2, %v3496_v9 }
  0x2d   : > { %2996 = vmatprep.mubr.msk.bf16.mxu0 %vm3367_vm1, %v3366_v3 }
  0xf5   : > { %v651_v18 = vpop.f32.mrb[0].mxu1 }
  0xf6   : > { %v652_v19 = vadd.f32 %v651_v18, %v3523_v16  ;;  %v2978_v20 = vpop.f32.mrb[1].mxu1 }
  0xf7   : > { %v654_v22 = vpop.f32.mrb[2].mxu1  ;;  %v590_v23 = vpop.f32.mrb[0].mxu0 }
  0xf8   : > { %v721_v24 = vpack.c.bf16 %v652_v19, %v652_v19  ;;  %v655_v25 = vadd.f32 %v654_v22, %v3523_v16  ;;  %v2979_v26 = vpop.f32.mrb[3].mxu1  ;;  %v2970_v27 = vpop.f32.mrb[1].mxu0  ;;  %v591_v32 = vadd.f32 %v590_v23, %v3530_v21 }
  0xf9   : > { %v593_v29 = vpop.f32.mrb[2].mxu0 }
  0xfa   : > { %v740_v30 = vsel %vm735_vm3, %v721_v24, 0  ;;  %v722_v31 = vpack.c.bf16 %v655_v25, %v655_v25  ;;  %v2971_v33 = vpop.f32.mrb[3].mxu0  ;;  %v719_v36 = vpack.c.bf16 %v591_v32, %v591_v32  ;;  %v594_v37 = vadd.f32 %v593_v29, %v3530_v21  ;;  %v3246_v32 = vld [vmem:[%s3457_s25 + $0x18] sm:$0xff]  }
  0xfb   : > { %2989 = vmatpush3.bf16.xpose.msra.mxu1 %v740_v30  ;;  %v3247_v33 = vld [vmem:[%s3452_s22 + $0x10] sm:$0xff]  }
  0xfc   : > { %v786_v34 = vsel %vm735_vm3, %v722_v31, 0  ;;  %3000 = vmatprep.subr.bf16.mxu1 %v3366_v3  ;;  %v720_v42 = vpack.c.bf16 %v594_v37, %v594_v37  ;;  %v3249_v37 = vld [vmem:[%s3462_s28 + $0x10] sm:$0xff]  }
  0xfd   : > { %2995 = vmatpush3.bf16.xpose.msra.mxu0 %v786_v34 }
  0xfe   : > { %3006 = vmatprep.subr.bf16.mxu0 %v3366_v3 }
  0xff   : > { %v712_v38 = vpop.f32.mrb[4].mxu0 }
 0x100   : > { %v713_v39 = vadd.f32 %v712_v38, %v3537_v35  ;;  %v2986_v40 = vpop.f32.mrb[5].mxu0  ;;  %v3250_v38 = vld [vmem:[%s3462_s28 + $0x18] sm:$0xff]  }
 0x101   : > { %v715_v41 = vpop.f32.mrb[6].mxu0 }
 0x102   : > { %2991 = vmatmul.mubr.msk.bf16.vlgmr.msra.gmra.mrb[4].mxu1 %vm735_vm3, %v719_v36  ;;  %v723_v43 = vpack.c.bf16 %v713_v39, %v713_v39  ;;  %v716_v44 = vadd.f32 %v715_v41, %v3537_v35  ;;  %v2987_v45 = vpop.f32.mrb[7].mxu0  ;;  %v3248_v36 = vld [vmem:[%s3452_s22 + $0x18] sm:$0xff]  }
 0x103   : > { %3002 = vmatprep.mubr.msk.bf16.mxu1 %vm3367_vm1, %v3366_v3 }
 0x104   : > { %2997 = vmatmul.mubr.msk.bf16.vlgmr.msra.gmra.mrb[8].mxu0 %vm735_vm3, %v720_v42  ;;  %v857_v46 = vsel %vm855_vm4, %v723_v43, 0  ;;  %v724_v47 = vpack.c.bf16 %v716_v44, %v716_v44 }
 0x105   : > { %3001 = vmatpush3.bf16.msra.mxu1 %v857_v46  ;;  %3008 = vmatprep.mubr.msk.bf16.mxu0 %vm3367_vm1, %v3366_v3 }
 0x106   : > { %v903_v48 = vsel %vm855_vm4, %v724_v47, 0  ;;  %3012 = vmatprep.subr.bf16.mxu1 %v3366_v3 }
 0x107   : > { %3007 = vmatpush3.bf16.msra.mxu0 %v903_v48 }
 0x108   : > { %3020 = vmatprep.subr.bf16.mxu0 %v3366_v3 }
 0x1d5   : > { %v776_v58 = vpop.f32.mrb[4].mxu1 }
 0x1d6   : > { %v2992_v60 = vpop.f32.mrb[5].mxu1  ;;  %v777_v4 = vadd.f32 %v776_v58, %v3562_v59 }
 0x1d7   : > { %v779_v61 = vpop.f32.mrb[6].mxu1  ;;  %v822_v62 = vpop.f32.mrb[8].mxu0 }
 0x1d8   : > { %v823_v63 = vadd.f32 %v822_v62, %v3559_v57  ;;  %v2993_v0 = vpop.f32.mrb[7].mxu1  ;;  %v2998_v1 = vpop.f32.mrb[9].mxu0  ;;  %v828_v7 = vsel %vm735_vm3, %v777_v4, -inf }
 0x1d9   : > { %v825_v2 = vpop.f32.mrb[10].mxu0 }
 0x1da   : > { %v2999_v5 = vpop.f32.mrb[11].mxu0  ;;  %v831_v6 = vsel %vm735_vm3, %v823_v63, -inf }
 0x1db   : > { %832 = vmax.xlane.f32.xlu0 %v831_v6 }
 0x1df   : > { %829 = vmax.xlane.f32.xlu0 %v828_v7 }
 0x1f5   : > { %1027 = vrot.lane.b32.xlu0 %v3523_v16, %s3369_s30 }
 0x268   : > { %v833_v8 = vpop.xlane.xlu0 %832 }
 0x269   : > { %v835_v10 = vsub.f32 %v823_v63, %v833_v8 }
 0x26b   : > { %v838_v11 = vmul.f32 1.442695, %v835_v10 }
 0x26c   : > { %v830_v12 = vpop.xlane.xlu0 %829 }
 0x26d   : > { %3269 = vpow2.f32 %v838_v11  ;;  %v834_v15 = vsub.f32 %v777_v4, %v830_v12 }
 0x26f   : > { %v836_v18 = vmul.f32 1.442695, %v834_v15 }
 0x270   : > { %v1028_v47 = vpop.permute.xlu0 %1027 }
 0x271   : > { %3271 = vpow2.f32 %v836_v18 }
 0x277   : > { %v3270_v19 = vpop.eup %3269 }
 0x278   : > { %v843_v20 = vsel %vm735_vm3, %v3270_v19, 0.0 }
 0x279   : > { %844 = vadd.xlane.f32.xlu1 %v843_v20 }
 0x27b   : > { %v3272_v22 = vpop.eup %3271 }
 0x27c   : > { %v840_v23 = vsel %vm735_vm3, %v3272_v22, 0.0 }
 0x27d   : > { %841 = vadd.xlane.f32.xlu1 %v840_v23 }
 0x28e   : > { %965 = vrot.lane.b32.xlu1 %v3530_v21, %s3369_s30 }
 0x306   : > { %v845_v24 = vpop.xlane.xlu1 %844 }
 0x307   : > { %3273 = vrcp.f32 %v845_v24 }
 0x30a   : > { %v842_v25 = vpop.xlane.xlu1 %841 }
 0x30b   : > { %3275 = vrcp.f32 %v842_v25 }
 0x30e   : > { %v966_v53 = vpop.permute.xlu1 %965 }
 0x311   : > { %v3274_v26 = vpop.eup %3273 }
 0x312   : > { %v849_v27 = vmul.f32 %v3274_v26, %v3270_v19 }
 0x314   : > { %v851_v29 = vpack.c.bf16 %v849_v27, %v849_v27 }
 0x315   : > { %v3276_v30 = vpop.eup %3275 }
 0x316   : > { %v848_v31 = vmul.f32 %v3276_v30, %v3272_v22  ;;  %3009 = vmatmul.mubr.msk.bf16.vlgmr.msra.gmra.mrb[12].mxu0 %vm735_vm3, %v851_v29 }
 0x317   : > { %3021 = vmatpush3.bf16.msra.mxu0 %v3245_v28  ;;  %3024 = vmatprep.mubr.msk.bf16.mxu0 %vm3367_vm1, %v3366_v3 }
 0x318   : > { %v850_v34 = vpack.c.bf16 %v848_v31, %v848_v31  ;;  %3022 = vmatprep.subr.bf16.mxu0 %v3366_v3 }
 0x31a   : > { %3003 = vmatmul.mubr.msk.bf16.vlgmr.msra.gmra.mrb[8].mxu1 %vm735_vm3, %v850_v34 }
 0x31b   : > { %3023 = vmatpush3.bf16.msra.mxu0 %v3246_v32  ;;  %3013 = vmatpush3.bf16.msra.mxu1 %v3247_v33 }
 0x31c   : > { %3014 = vmatprep.subr.bf16.mxu1 %v3366_v3  ;;  %3016 = vmatprep.mubr.msk.bf16.mxu1 %vm3367_vm1, %v3366_v3 }
 0x31d   : > { %3036 = vmatprep.subr.bf16.mxu0 %v3366_v3 }
 0x31e   : > { %3025 = vmatmul.mubr.msk.bf16.vlgmr.msra.gmra.mrb[16].mxu0 %vm552_vm2, %v3496_v9 }
 0x31f   : > { %3015 = vmatpush3.bf16.msra.mxu1 %v3248_v36  ;;  %3038 = vmatprep.mubr.msk.bf16.mxu0 %vm3367_vm1, %v3366_v3 }
 0x320   : > { %3028 = vmatprep.subr.bf16.mxu1 %v3366_v3 }
 0x322   : > { %3017 = vmatmul.mubr.msk.bf16.vlgmr.msra.gmra.mrb[12].mxu1 %vm552_vm2, %v3496_v9 }
 0x323   : > { %3032 = vmatprep.mubr.msk.bf16.mxu1 %vm3367_vm1, %v3366_v3  ;;  %3029 = vmatpush3.bf16.msra.mxu1 %v3249_v37 }
 0x324   : > { %3030 = vmatprep.subr.bf16.mxu1 %v3366_v3 }
 0x327   : > { %3031 = vmatpush3.bf16.msra.mxu1 %v3250_v38 }
 0x328   : > { %3042 = vmatprep.subr.bf16.mxu1 %v3366_v3 }
 0x32a   : > { %3033 = vmatmul.mubr.msk.bf16.vlgmr.msra.gmra.mrb[16].mxu1 %vm552_vm2, %v3496_v9 }
 0x32b   : > { %3044 = vmatprep.mubr.msk.bf16.mxu1 %vm3367_vm1, %v3366_v3 }
 0x3e9   : > { %v3604_v39 = vpop.f32.mrb[12].mxu0 }
 0x3ea   : > { %v3010_v40 = vpop.f32.mrb[13].mxu0 }
 0x3eb   : > { %v942_v41 = vpop.f32.mrb[14].mxu0 }
 0x3ec   : > { %v3011_v42 = vpop.f32.mrb[15].mxu0 }
 0x3ed   : > { %v3606_v43 = vpop.f32.mrb[8].mxu1 }
 0x3ee   : > { %v945_v44 = vpack.c.bf16 %v3604_v39, %v3606_v43  ;;  %v3004_v45 = vpop.f32.mrb[9].mxu1 }
 0x3ef   : > { %v896_v46 = vpop.f32.mrb[10].mxu1 }
 0x3f0   : > { %v3005_v48 = vpop.f32.mrb[11].mxu1 }
 0x3f1   : > { %v1064_v49 = vpop.f32.mrb[16].mxu0 }
 0x3f2   : > { %v1065_v50 = vadd.f32 %v1064_v49, %v1028_v47  ;;  %v3026_v51 = vpop.f32.mrb[17].mxu0 }
 0x3f3   : > { %v1067_v52 = vpop.f32.mrb[18].mxu0 }
 0x3f4   : > { %v1135_v54 = vpack.c.bf16 %v1065_v50, %v1065_v50  ;;  %v1068_v55 = vadd.f32 %v1067_v52, %v1028_v47  ;;  %v3027_v56 = vpop.f32.mrb[19].mxu0 }
 0x3f5   : > { %v1002_v58 = vpop.f32.mrb[12].mxu1  ;;  %v946_v56 = vld [vmem:[%s3467_s17] sm:$0xf] }
 0x3f6   : > { %v1143_v60 = vsel %vm735_vm3, %v1135_v54, 0  ;;  %v1136_v61 = vpack.c.bf16 %v1068_v55, %v1068_v55  ;;  %v3018_v62 = vpop.f32.mrb[13].mxu1  ;;  %v1003_v63 = vadd.f32 %v1002_v58, %v966_v53 }
 0x3f7   : > { %3037 = vmatpush3.bf16.xpose.msra.mxu0 %v1143_v60  ;;  %v1005_v0 = vpop.f32.mrb[14].mxu1 }
 0x3f8   : > { %v1189_v1 = vsel %vm735_vm3, %v1136_v61, 0  ;;  %v3019_v2 = vpop.f32.mrb[15].mxu1  ;;  %3048 = vmatprep.subr.bf16.mxu0 %v3366_v3  ;;  %v1006_v4 = vadd.f32 %v1005_v0, %v966_v53  ;;  %v1133_v5 = vpack.c.bf16 %v1003_v63, %v1003_v63  ;;  %v2804_v53 = vld [vmem:[%s3467_s17 + $0x4] sm:$0xf]  ;;  %v1401_v63 = vsel %vm855_vm4, %v946_v56, 0 }
 0x3f9   : > { %3043 = vmatpush3.bf16.xpose.msra.mxu1 %v1189_v1  ;;  %v1354_v61 = vsel %vm855_vm4, %v2804_v53, 0  ;;  %v3251_v0 = vld [vmem:[%s3457_s25 + $0x20] sm:$0xff]   ;;  %v3252_v1 = vld [vmem:[%s3457_s25 + $0x28] sm:$0xff]  }
 0x3fa   : > { %3054 = vmatprep.subr.bf16.mxu1 %v3366_v3  ;;  %v1134_v6 = vpack.c.bf16 %v1006_v4, %v1006_v4  ;;  %v3253_v4 = vld [vmem:[%s3452_s22 + $0x20] sm:$0xff]  }
 0x3fd   : > { %v1126_v7 = vpop.f32.mrb[16].mxu1 }
 0x3fe   : > { %3039 = vmatmul.mubr.msk.bf16.vlgmr.msra.gmra.mrb[20].mxu0 %vm735_vm3, %v1133_v5  ;;  %v3034_v8 = vpop.f32.mrb[17].mxu1 }
 0x3ff   : > { %3050 = vmatprep.mubr.msk.bf16.mxu0 %vm3367_vm1, %v3366_v3  ;;  %v1129_v10 = vpop.f32.mrb[18].mxu1 }
 0x400   : > { %3045 = vmatmul.mubr.msk.bf16.vlgmr.msra.gmra.mrb[20].mxu1 %vm735_vm3, %v1134_v6  ;;  %v3035_v11 = vpop.f32.mrb[19].mxu1 }
 0x401   : > { %3056 = vmatprep.mubr.msk.bf16.mxu1 %vm3367_vm1, %v3366_v3  ;;  %v3254_v11 = vld [vmem:[%s3452_s22 + $0x28] sm:$0xff]  }
 0x4d1   : > { %v1179_v12 = vpop.f32.mrb[20].mxu0 }
 0x4d2   : > { %v1180_v15 = vadd.f32 %v1179_v12, %v3562_v59  ;;  %v3040_v18 = vpop.f32.mrb[21].mxu0 }
 0x4d3   : > { %v1182_v19 = vpop.f32.mrb[22].mxu0  ;;  %v1225_v20 = vpop.f32.mrb[20].mxu1 }
 0x4d4   : > { %v1226_v22 = vadd.f32 %v1225_v20, %v3559_v57  ;;  %v3041_v23 = vpop.f32.mrb[23].mxu0  ;;  %v3046_v24 = vpop.f32.mrb[21].mxu1  ;;  %v1231_v25 = vsel %vm735_vm3, %v1180_v15, -inf }
 0x4d5   : > { %v1228_v26 = vpop.f32.mrb[22].mxu1  ;;  %1232 = vmax.xlane.f32.xlu1 %v1231_v25 }
 0x4d6   : > { %v3047_v27 = vpop.f32.mrb[23].mxu1  ;;  %v1234_v28 = vsel %vm735_vm3, %v1226_v22, -inf }
 0x4d7   : > { %1235 = vmax.xlane.f32.xlu0 %v1234_v28 }
 0x562   : > { %v1233_v29 = vpop.xlane.xlu1 %1232 }
 0x563   : > { %v1237_v30 = vsub.f32 %v1180_v15, %v1233_v29  ;;  %v3255_v15 = vld [vmem:[%s3462_s28 + $0x20] sm:$0xff]  }
 0x564   : > { %v1236_v31 = vpop.xlane.xlu0 %1235 }
 0x565   : > { %v1239_v32 = vmul.f32 1.442695, %v1237_v30  ;;  %v1238_v33 = vsub.f32 %v1226_v22, %v1236_v31  ;;  %v3256_v22 = vld [vmem:[%s3462_s28 + $0x28] sm:$0xff]  }
 0x567   : > { %3277 = vpow2.f32 %v1239_v32  ;;  %v1241_v34 = vmul.f32 1.442695, %v1238_v33 }
 0x569   : > { %3279 = vpow2.f32 %v1241_v34 }
 0x571   : > { %v3278_v36 = vpop.eup %3277 }
 0x572   : > { %v1243_v37 = vsel %vm735_vm3, %v3278_v36, 0.0 }
 0x573   : > { %v3280_v38 = vpop.eup %3279  ;;  %1244 = vadd.xlane.f32.xlu0 %v1243_v37 }
 0x574   : > { %v1246_v40 = vsel %vm735_vm3, %v3280_v38, 0.0 }
 0x575   : > { %1247 = vadd.xlane.f32.xlu1 %v1246_v40 }
 0x586   : > { %1522 = vrot.lane.b32.xlu1 %v3523_v16, %s3370_s14 }
 0x589   : > { %1089 = vrot.lane.b32.xlu0 %v3537_v35, %s3369_s30 }
 0x58a   : > { %1461 = vrot.lane.b32.xlu1 %v3530_v21, %s3370_s14 }
 0x600   : > { %v1245_v41 = vpop.xlane.xlu0 %1244 }
 0x601   : > { %3281 = vrcp.f32 %v1245_v41 }
 0x602   : > { %v1248_v42 = vpop.xlane.xlu1 %1247 }
 0x603   : > { %3283 = vrcp.f32 %v1248_v42 }
 0x604   : > { %v1090_v45 = vpop.permute.xlu0 %1089 }
 0x605   : > { %v1127_v46 = vadd.f32 %v1126_v7, %v1090_v45  ;;  %v1130_v47 = vadd.f32 %v1129_v10, %v1090_v45 }
 0x606   : > { %v1523_v27 = vpop.permute.xlu1 %1522 }
 0x607   : > { %v1137_v48 = vpack.c.bf16 %v1127_v46, %v1127_v46  ;;  %v1138_v49 = vpack.c.bf16 %v1130_v47, %v1130_v47 }
 0x609   : > { %v1259_v50 = vsel %vm855_vm4, %v1137_v48, 0  ;;  %v1305_v51 = vsel %vm855_vm4, %v1138_v49, 0 }
 0x60a   : > { %3049 = vmatpush3.bf16.msra.mxu0 %v1259_v50  ;;  %3055 = vmatpush3.bf16.msra.mxu1 %v1305_v51  ;;  %v1462_v42 = vpop.permute.xlu1 %1461 }
 0x60b   : > { %v3282_v52 = vpop.eup %3281  ;;  %3066 = vmatprep.subr.bf16.mxu1 %v3366_v3  ;;  %3060 = vmatprep.subr.bf16.mxu0 %v3366_v3 }
 0x60c   : > { %v1251_v54 = vmul.f32 %v3282_v52, %v3278_v36 }
 0x60d   : > { %v3284_v55 = vpop.eup %3283 }
 0x60e   : > { %v1252_v58 = vmul.f32 %v3284_v55, %v3280_v38  ;;  %v1253_v60 = vpack.c.bf16 %v1251_v54, %v1251_v54 }
 0x610   : > { %3051 = vmatmul.mubr.msk.bf16.vlgmr.msra.gmra.mrb[24].mxu0 %vm735_vm3, %v1253_v60  ;;  %v1254_v62 = vpack.c.bf16 %v1252_v58, %v1252_v58 }
 0x611   : > { %3061 = vmatpush3.bf16.msra.mxu0 %v1354_v61  ;;  %3062 = vmatprep.mubr.msk.bf16.mxu0 %vm3367_vm1, %v3366_v3 }
 0x612   : > { %3057 = vmatmul.mubr.msk.bf16.vlgmr.msra.gmra.mrb[24].mxu1 %vm735_vm3, %v1254_v62  ;;  %3072 = vmatprep.subr.bf16.mxu0 %v3366_v3 }
 0x613   : > { %3067 = vmatpush3.bf16.msra.mxu1 %v1401_v63  ;;  %3068 = vmatprep.mubr.msk.bf16.mxu1 %vm3367_vm1, %v3366_v3 }
 0x614   : > { %3080 = vmatprep.subr.bf16.mxu1 %v3366_v3 }
 0x61a   : > { %3069 = vmatmul.mubr.msk.bf16.vlgmr.msra.gmra.mrb[28].mxu1 %vm735_vm3, %v945_v44 }
 0x61b   : > { %3081 = vmatpush3.bf16.msra.mxu1 %v3251_v0  ;;  %3084 = vmatprep.mubr.msk.bf16.mxu1 %vm3367_vm1, %v3366_v3 }
 0x61c   : > { %3082 = vmatprep.subr.bf16.mxu1 %v3366_v3 }
 0x61f   : > { %3083 = vmatpush3.bf16.msra.mxu1 %v3252_v1 }
 0x620   : > { %3096 = vmatprep.subr.bf16.mxu1 %v3366_v3 }
 0x622   : > { %3085 = vmatmul.mubr.msk.bf16.vlgmr.msra.gmra.mrb[32].mxu1 %vm552_vm2, %v3496_v9 }
 0x623   : > { %3098 = vmatprep.mubr.msk.bf16.mxu1 %vm3367_vm1, %v3366_v3 }
 0x6e3   : > { %v1295_v39 = vpop.f32.mrb[24].mxu0 }
 0x6e4   : > { %v3052_v43 = vpop.f32.mrb[25].mxu0 }
 0x6e5   : > { %v1298_v44 = vpop.f32.mrb[26].mxu0  ;;  %v1341_v2 = vpop.f32.mrb[24].mxu1 }
 0x6e6   : > { %v1347_v5 = vpack.c.bf16 %v1341_v2, %v1295_v39  ;;  %v3053_v6 = vpop.f32.mrb[27].mxu0  ;;  %v3058_v7 = vpop.f32.mrb[25].mxu1 }
 0x6e7   : > { %v1344_v8 = vpop.f32.mrb[26].mxu1 }
 0x6e8   : > { %v3059_v10 = vpop.f32.mrb[27].mxu1  ;;  %3063 = vmatmul.mubr.msk.bf16.vlgmr.msra.gmra.mrb[28].mxu0 %vm735_vm3, %v1347_v5 }
 0x6e9   : > { %3073 = vmatpush3.bf16.msra.mxu0 %v3253_v4  ;;  %3076 = vmatprep.mubr.msk.bf16.mxu0 %vm3367_vm1, %v3366_v3 }
 0x6ea   : > { %3074 = vmatprep.subr.bf16.mxu0 %v3366_v3 }
 0x6ed   : > { %v1437_v12 = vpop.f32.mrb[28].mxu1  ;;  %3075 = vmatpush3.bf16.msra.mxu0 %v3254_v11 }
 0x6ee   : > { %v3070_v18 = vpop.f32.mrb[29].mxu1  ;;  %3088 = vmatprep.subr.bf16.mxu0 %v3366_v3 }
 0x6ef   : > { %v1440_v19 = vpop.f32.mrb[30].mxu1 }
 0x6f0   : > { %v3071_v20 = vpop.f32.mrb[31].mxu1  ;;  %3077 = vmatmul.mubr.msk.bf16.vlgmr.msra.gmra.mrb[32].mxu0 %vm552_vm2, %v3496_v9 }
 0x6f1   : > { %3089 = vmatpush3.bf16.msra.mxu0 %v3255_v15  ;;  %3092 = vmatprep.mubr.msk.bf16.mxu0 %vm3367_vm1, %v3366_v3 }
 0x6f2   : > { %3090 = vmatprep.subr.bf16.mxu0 %v3366_v3 }
 0x6f5   : > { %v1559_v23 = vpop.f32.mrb[32].mxu1  ;;  %3091 = vmatpush3.bf16.msra.mxu0 %v3256_v22 }
 0x6f6   : > { %v3086_v24 = vpop.f32.mrb[33].mxu1  ;;  %3102 = vmatprep.subr.bf16.mxu0 %v3366_v3  ;;  %v1560_v28 = vadd.f32 %v1559_v23, %v1523_v27 }
 0x6f7   : > { %v1562_v25 = vpop.f32.mrb[34].mxu1 }
 0x6f8   : > { %v3087_v26 = vpop.f32.mrb[35].mxu1  ;;  %3093 = vmatmul.mubr.msk.bf16.vlgmr.msra.gmra.mrb[36].mxu0 %vm552_vm2, %v3496_v9  ;;  %v1563_v29 = vadd.f32 %v1562_v25, %v1523_v27  ;;  %v1629_v30 = vpack.c.bf16 %v1560_v28, %v1560_v28 }
 0x6f9   : > { %3104 = vmatprep.mubr.msk.bf16.mxu0 %vm3367_vm1, %v3366_v3 }
 0x6fa   : > { %v1630_v31 = vpack.c.bf16 %v1563_v29, %v1563_v29  ;;  %v1637_v32 = vsel %vm735_vm3, %v1629_v30, 0 }
 0x6fb   : > { %3097 = vmatpush3.bf16.xpose.msra.mxu1 %v1637_v32 }
 0x6fc   : > { %v1683_v33 = vsel %vm735_vm3, %v1630_v31, 0  ;;  %3108 = vmatprep.subr.bf16.mxu1 %v3366_v3 }
 0x6fe   : > { %3103 = vmatpush3.bf16.xpose.msra.mxu0 %v1683_v33 }
 0x6ff   : > { %3114 = vmatprep.subr.bf16.mxu0 %v3366_v3 }
 0x7bb   : > { %v1390_v34 = vpop.f32.mrb[28].mxu0 }
 0x7bc   : > { %v3685_v36 = vadd.f32 %v1437_v12, %v1390_v34  ;;  %v3064_v37 = vpop.f32.mrb[29].mxu0 }
 0x7bd   : > { %v1393_v38 = vpop.f32.mrb[30].mxu0 }
 0x7be   : > { %v3687_v40 = vadd.f32 %v1440_v19, %v1393_v38  ;;  %v3065_v41 = vpop.f32.mrb[31].mxu0  ;;  %v2832_v38 = vld [vmem:[%s3467_s17 + $0x8] sm:$0xf] }
 0x7bf   : > { %v1848_v41 = vsel %vm855_vm4, %v2832_v38, 0 }
 0x7c3   : > { %v1498_v45 = vpop.f32.mrb[32].mxu0 }
 0x7c4   : > { %v1499_v46 = vadd.f32 %v1498_v45, %v1462_v42  ;;  %v3078_v47 = vpop.f32.mrb[33].mxu0  ;;  %v3260_v45 = vld [vmem:[%s3452_s22 + $0x38] sm:$0xff]  }
 0x7c5   : > { %v1501_v48 = vpop.f32.mrb[34].mxu0 }
 0x7c6   : > { %v1627_v49 = vpack.c.bf16 %v1499_v46, %v1499_v46  ;;  %v1502_v50 = vadd.f32 %v1501_v48, %v1462_v42  ;;  %v3079_v51 = vpop.f32.mrb[35].mxu0  ;;  %v3259_v42 = vld [vmem:[%s3452_s22 + $0x30] sm:$0xff]   ;;  %s3372_s22 = smov [#allocation2]  }
 0x7c8   : > { %v1628_v52 = vpack.c.bf16 %v1502_v50, %v1502_v50  ;;  %3099 = vmatmul.mubr.msk.bf16.vlgmr.msra.gmra.mrb[36].mxu1 %vm735_vm3, %v1627_v49 }
 0x7c9   : > { %3110 = vmatprep.mubr.msk.bf16.mxu1 %vm3367_vm1, %v3366_v3 }
 0x7ca   : > { %3105 = vmatmul.mubr.msk.bf16.vlgmr.msra.gmra.mrb[40].mxu0 %vm735_vm3, %v1628_v52 }
 0x7cb   : > { %v1620_v53 = vpop.f32.mrb[36].mxu0  ;;  %3116 = vmatprep.mubr.msk.bf16.mxu0 %vm3367_vm1, %v3366_v3 }
 0x7cc   : > { %v3094_v54 = vpop.f32.mrb[37].mxu0 }
 0x7cd   : > { %v1623_v55 = vpop.f32.mrb[38].mxu0  ;;  %v3258_v54 = vld [vmem:[%s3457_s25 + $0x38] sm:$0xff]  }
 0x7ce   : > { %v3095_v56 = vpop.f32.mrb[39].mxu0 }
 0x7cf   : > { %v3262_v56 = vld [vmem:[%s3462_s28 + $0x38] sm:$0xff]  }
 0x89b   : > { %v1673_v58 = vpop.f32.mrb[36].mxu1 }
 0x89c   : > { %v1674_v60 = vadd.f32 %v1673_v58, %v3562_v59  ;;  %v3100_v61 = vpop.f32.mrb[37].mxu1 }
 0x89d   : > { %v1676_v62 = vpop.f32.mrb[38].mxu1  ;;  %v1719_v63 = vpop.f32.mrb[40].mxu0 }
 0x89e   : > { %v1720_v0 = vadd.f32 %v1719_v63, %v3559_v57  ;;  %v3101_v1 = vpop.f32.mrb[39].mxu1  ;;  %v3106_v39 = vpop.f32.mrb[41].mxu0  ;;  %v1725_v43 = vsel %vm735_vm3, %v1674_v60, -inf }
 0x89f   : > { %1726 = vmax.xlane.f32.xlu1 %v1725_v43  ;;  %v1722_v44 = vpop.f32.mrb[42].mxu0 }
 0x8a0   : > { %v3107_v2 = vpop.f32.mrb[43].mxu0  ;;  %v1728_v4 = vsel %vm735_vm3, %v1720_v0, -inf }
 0x8a1   : > { %1729 = vmax.xlane.f32.xlu0 %v1728_v4 }
 0x8b0   : > { %1583 = vrot.lane.b32.xlu1 %v3537_v35, %s3370_s14 }
 0x8b4   : > { %1910 = vrot.lane.b32.xlu1 %v3530_v21, %s3371_s15 }
 0x92c   : > { %v1727_v5 = vpop.xlane.xlu1 %1726 }
 0x92d   : > { %v1731_v6 = vsub.f32 %v1674_v60, %v1727_v5 }
 0x92e   : > { %v1730_v7 = vpop.xlane.xlu0 %1729 }
 0x92f   : > { %v1733_v8 = vmul.f32 1.442695, %v1731_v6  ;;  %v1732_v10 = vsub.f32 %v1720_v0, %v1730_v7 }
 0x930   : > { %v1584_v11 = vpop.permute.xlu1 %1583 }
 0x931   : > { %3285 = vpow2.f32 %v1733_v8  ;;  %v1735_v12 = vmul.f32 1.442695, %v1732_v10  ;;  %v1621_v15 = vadd.f32 %v1620_v53, %v1584_v11  ;;  %v1624_v18 = vadd.f32 %v1623_v55, %v1584_v11  ;;  %v3261_v55 = vld [vmem:[%s3462_s28 + $0x30] sm:$0xff]   ;;  %s3878_s28 = sadd.s32 4294967295, %s3364_s11  }
 0x932   : > { %p3828_p6 = scmp.eq.s32.totalorder %s3878_s28, 1 }
 0x933   : > { %3287 = vpow2.f32 %v1735_v12  ;;  %v1631_v19 = vpack.c.bf16 %v1621_v15, %v1621_v15  ;;  %v1632_v20 = vpack.c.bf16 %v1624_v18, %v1624_v18 }
 0x934   : > { %v1911_v7 = vpop.permute.xlu1 %1910 }
 0x935   : > { %v1753_v22 = vsel %vm855_vm4, %v1631_v19, 0  ;;  %v1799_v23 = vsel %vm855_vm4, %v1632_v20, 0 }
 0x936   : > { %3109 = vmatpush3.bf16.msra.mxu1 %v1753_v22  ;;  %3115 = vmatpush3.bf16.msra.mxu0 %v1799_v23 }
 0x937   : > { %3120 = vmatprep.subr.bf16.mxu1 %v3366_v3  ;;  %3126 = vmatprep.subr.bf16.mxu0 %v3366_v3 }
 0x93b   : > { %v3286_v24 = vpop.eup %3285 }
 0x93c   : > { %v1737_v25 = vsel %vm735_vm3, %v3286_v24, 0.0 }
 0x93d   : > { %v3288_v26 = vpop.eup %3287  ;;  %1738 = vadd.xlane.f32.xlu0 %v1737_v25 }
 0x93e   : > { %v1740_v27 = vsel %vm735_vm3, %v3288_v26, 0.0 }
 0x941   : > { %1741 = vadd.xlane.f32.xlu0 %v1740_v27 }
 0x957   : > { %1971 = vrot.lane.b32.xlu0 %v3523_v16, %s3371_s15  ;;  %v3257_v16 = vld [vmem:[%s3457_s25 + $0x30] sm:$0xff]   ;;  %s2589_s25 = sshll.u32 %s3372_s22, 4  ;;  %s2590_s25 = int_to_ptr.vmem [resolvable:$true] %s2589_s25 }
 0x958   : > { %p3319_p10 = scmp.lt.s32.totalorder %s2590_s25, %s2590_s25 }
 0x9ca   : > { %v1739_v28 = vpop.xlane.xlu0 %1738 }
 0x9cb   : > { %3289 = vrcp.f32 %v1739_v28 }
 0x9ce   : > { %v1742_v29 = vpop.xlane.xlu0 %1741 }
 0x9cf   : > { %3291 = vrcp.f32 %v1742_v29 }
 0x9d2   : > { %v1972_v2 = vpop.permute.xlu0 %1971 }
 0x9d5   : > { %v3290_v30 = vpop.eup %3289 }
 0x9d6   : > { %v1745_v31 = vmul.f32 %v3290_v30, %v3286_v24 }
 0x9d8   : > { %v1747_v32 = vpack.c.bf16 %v1745_v31, %v1745_v31 }
 0x9d9   : > { %v3292_v33 = vpop.eup %3291 }
 0x9da   : > { %v1746_v34 = vmul.f32 %v3292_v33, %v3288_v26  ;;  %3111 = vmatmul.mubr.msk.bf16.vlgmr.msra.gmra.mrb[40].mxu1 %vm735_vm3, %v1747_v32 }
 0x9db   : > { %3122 = vmatprep.mubr.msk.bf16.mxu1 %vm3367_vm1, %v3366_v3  ;;  %3121 = vmatpush3.bf16.msra.mxu1 %v1848_v41 }
 0x9dc   : > { %v1748_v37 = vpack.c.bf16 %v1746_v34, %v1746_v34  ;;  %3134 = vmatprep.subr.bf16.mxu1 %v3366_v3 }
 0x9de   : > { %3117 = vmatmul.mubr.msk.bf16.vlgmr.msra.gmra.mrb[44].mxu0 %vm735_vm3, %v1748_v37 }
 0x9df   : > { %3130 = vmatprep.mubr.msk.bf16.mxu0 %vm3367_vm1, %v3366_v3  ;;  %3127 = vmatpush3.bf16.msra.mxu0 %v3259_v42 }
 0x9e0   : > { %3128 = vmatprep.subr.bf16.mxu0 %v3366_v3 }
 0x9e3   : > { %3129 = vmatpush3.bf16.msra.mxu0 %v3260_v45 }
 0x9e4   : > { %3142 = vmatprep.subr.bf16.mxu0 %v3366_v3 }
 0x9e6   : > { %3131 = vmatmul.mubr.msk.bf16.vlgmr.msra.gmra.mrb[48].mxu0 %vm552_vm2, %v3496_v9 }
 0x9e7   : > { %3146 = vmatprep.mubr.msk.bf16.mxu0 %vm3367_vm1, %v3366_v3  ;;  %3143 = vmatpush3.bf16.msra.mxu0 %v3261_v55 }
 0x9e8   : > { %3144 = vmatprep.subr.bf16.mxu0 %v3366_v3 }
 0x9eb   : > { %3145 = vmatpush3.bf16.msra.mxu0 %v3262_v56 }
 0x9ec   : > { %3156 = vmatprep.subr.bf16.mxu0 %v3366_v3 }
 0x9ee   : > { %3147 = vmatmul.mubr.msk.bf16.vlgmr.msra.gmra.mrb[52].mxu0 %vm552_vm2, %v3496_v9 }
 0x9ef   : > { %3158 = vmatprep.mubr.msk.bf16.mxu0 %vm3367_vm1, %v3366_v3 }
 0xaad   : > { %v1789_v46 = vpop.f32.mrb[40].mxu1 }
 0xaae   : > { %v3112_v47 = vpop.f32.mrb[41].mxu1 }
 0xaaf   : > { %v1792_v48 = vpop.f32.mrb[42].mxu1 }
 0xab0   : > { %v3113_v49 = vpop.f32.mrb[43].mxu1 }
 0xab1   : > { %v1835_v50 = vpop.f32.mrb[44].mxu0 }
 0xab2   : > { %v1841_v51 = vpack.c.bf16 %v1835_v50, %v1789_v46  ;;  %v3118_v21 = vpop.f32.mrb[45].mxu0 }
 0xab3   : > { %v1838_v52 = vpop.f32.mrb[46].mxu0 }
 0xab4   : > { %v3119_v53 = vpop.f32.mrb[47].mxu0  ;;  %3123 = vmatmul.mubr.msk.bf16.vlgmr.msra.gmra.mrb[44].mxu1 %vm735_vm3, %v1841_v51 }
 0xab5   : > { %3135 = vmatpush3.bf16.msra.mxu1 %v3257_v16  ;;  %3138 = vmatprep.mubr.msk.bf16.mxu1 %vm3367_vm1, %v3366_v3 }
 0xab6   : > { %3136 = vmatprep.subr.bf16.mxu1 %v3366_v3 }
 0xab9   : > { %3137 = vmatpush3.bf16.msra.mxu1 %v3258_v54  ;;  %v1947_v58 = vpop.f32.mrb[48].mxu0 }
 0xaba   : > { %3150 = vmatprep.subr.bf16.mxu1 %v3366_v3  ;;  %v3132_v60 = vpop.f32.mrb[49].mxu0 }
 0xabb   : > { %v1950_v61 = vpop.f32.mrb[50].mxu0 }
 0xabc   : > { %3139 = vmatmul.mubr.msk.bf16.vlgmr.msra.gmra.mrb[48].mxu1 %vm552_vm2, %v3496_v9  ;;  %v3133_v62 = vpop.f32.mrb[51].mxu0  ;;  %v1951_v19 = vadd.f32 %v1950_v61, %v1911_v7 }
 0xabd   : > { %3152 = vmatprep.mubr.msk.bf16.mxu1 %vm3367_vm1, %v3366_v3 }
 0xabe   : > { %v2077_v20 = vpack.c.bf16 %v1951_v19, %v1951_v19 }
 0xac1   : > { %v2069_v22 = vpop.f32.mrb[52].mxu0 }
 0xac2   : > { %v3148_v23 = vpop.f32.mrb[53].mxu0 }
 0xac3   : > { %v2072_v24 = vpop.f32.mrb[54].mxu0 }
 0xac4   : > { %v3149_v25 = vpop.f32.mrb[55].mxu0 }
 0xb87   : > { %v1884_v63 = vpop.f32.mrb[44].mxu1 }
 0xb88   : > { %v3748_v0 = vadd.f32 %v1884_v63, %v3685_v36  ;;  %v3124_v1 = vpop.f32.mrb[45].mxu1  ;;  %v1948_v36 = vadd.f32 %v1947_v58, %v1911_v7 }
 0xb89   : > { %v1887_v39 = vpop.f32.mrb[46].mxu1 }
 0xb8a   : > { %v3751_v43 = vadd.f32 %v1887_v39, %v3687_v40  ;;  %v3125_v44 = vpop.f32.mrb[47].mxu1  ;;  %v2076_v40 = vpack.c.bf16 %v1948_v36, %v1948_v36  ;;  %v3789_v36 = vld [vmem:[%s3447_s19] sm:$0xff] }
 0xb8f   : > { %v2008_v4 = vpop.f32.mrb[48].mxu1 }
 0xb90   : > { %v2009_v9 = vadd.f32 %v2008_v4, %v1972_v2  ;;  %v3140_v5 = vpop.f32.mrb[49].mxu1 }
 0xb91   : > { %v2011_v6 = vpop.f32.mrb[50].mxu1 }
 0xb92   : > { %v2078_v8 = vpack.c.bf16 %v2009_v9, %v2009_v9  ;;  %v2012_v10 = vadd.f32 %v2011_v6, %v1972_v2  ;;  %v3141_v11 = vpop.f32.mrb[51].mxu1 }
 0xb94   : > { %v2086_v12 = vsel %vm735_vm3, %v2078_v8, 0  ;;  %v2079_v15 = vpack.c.bf16 %v2012_v10, %v2012_v10 }
 0xb95   : > { %3151 = vmatpush3.bf16.xpose.msra.mxu1 %v2086_v12 }
 0xb96   : > { %v2132_v18 = vsel %vm735_vm3, %v2079_v15, 0  ;;  %3162 = vmatprep.subr.bf16.mxu1 %v3366_v3  ;;  %v2344_v15 = vsub.s32 3, %v3517_v13 }
 0xb97   : > { %3157 = vmatpush3.bf16.xpose.msra.mxu0 %v2132_v18 }
 0xb98   : > { %3168 = vmatprep.subr.bf16.mxu0 %v3366_v3  ;;  %v2345_v18 = vrot.slane %v3789_v36, %v2344_v15 }
 0xb9c   : > { %3153 = vmatmul.mubr.msk.bf16.vlgmr.msra.gmra.mrb[52].mxu1 %vm735_vm3, %v2076_v40 }
 0xb9d   : > { %3164 = vmatprep.mubr.msk.bf16.mxu1 %vm3367_vm1, %v3366_v3 }
 0xb9e   : > { %3159 = vmatmul.mubr.msk.bf16.vlgmr.msra.gmra.mrb[56].mxu0 %vm735_vm3, %v2077_v20 }
 0xb9f   : > { %3170 = vmatprep.mubr.msk.bf16.mxu0 %vm3367_vm1, %v3366_v3 }
 0xc6f   : > { %v2122_v26 = vpop.f32.mrb[52].mxu1 }
 0xc70   : > { %v2123_v27 = vadd.f32 %v2122_v26, %v3562_v59  ;;  %v3154_v28 = vpop.f32.mrb[53].mxu1 }
 0xc71   : > { %v2125_v29 = vpop.f32.mrb[54].mxu1  ;;  %v2168_v30 = vpop.f32.mrb[56].mxu0 }
 0xc72   : > { %v2169_v31 = vadd.f32 %v2168_v30, %v3559_v57  ;;  %v3155_v32 = vpop.f32.mrb[55].mxu1  ;;  %v3160_v33 = vpop.f32.mrb[57].mxu0  ;;  %v2174_v34 = vsel %vm735_vm3, %v2123_v27, -inf  ;;  %v3311_v30 = vld [vmem:[#allocation2 + $0x8] sm:$0xff] }
 0xc73   : > { %2175 = vmax.xlane.f32.xlu1 %v2174_v34  ;;  %v2171_v37 = vpop.f32.mrb[58].mxu0 }
 0xc74   : > { %v3161_v38 = vpop.f32.mrb[59].mxu0  ;;  %v2177_v41 = vsel %vm735_vm3, %v2169_v31, -inf }
 0xc75   : > { %2178 = vmax.xlane.f32.xlu0 %v2177_v41 }
 0xd00   : > { %v2176_v42 = vpop.xlane.xlu1 %2175 }
 0xd01   : > { %v2180_v45 = vsub.f32 %v2123_v27, %v2176_v42  ;;  %v3310_v27 = vld [vmem:[#allocation2] sm:$0xff] }
 0xd02   : > { %v2179_v46 = vpop.xlane.xlu0 %2178 }
 0xd03   : > { %v2182_v47 = vmul.f32 1.442695, %v2180_v45  ;;  %v2181_v59 = vsub.f32 %v2169_v31, %v2179_v46 }
 0xd05   : > { %3293 = vpow2.f32 %v2182_v47  ;;  %v2184_v48 = vmul.f32 1.442695, %v2181_v59  ;;  %v3263_v47 = vld [vmem:[%s3472_s20] sm:$0xff]   ;;  %v3264_v59 = vld [vmem:[%s3472_s20 + $0x8] sm:$0xff]  }
 0xd07   : > { %3295 = vpow2.f32 %v2184_v48  ;;  %v3265_v48 = vld [vmem:[%s3477_s24] sm:$0xff]  }
 0xd0f   : > { %v3294_v49 = vpop.eup %3293 }
 0xd10   : > { %v2186_v57 = vsel %vm735_vm3, %v3294_v49, 0.0 }
 0xd11   : > { %v3296_v50 = vpop.eup %3295  ;;  %2187 = vadd.xlane.f32.xlu0 %v2186_v57 }
 0xd12   : > { %v2189_v16 = vsel %vm735_vm3, %v3296_v50, 0.0 }
 0xd13   : > { %2190 = vadd.xlane.f32.xlu1 %v2189_v16 }
 0xd27   : > { %2032 = vrot.lane.b32.xlu0 %v3537_v35, %s3371_s15  ;;  %v2859_v35 = vld [vmem:[%s3467_s17 + $0xc] sm:$0xf] }
 0xd28   : > { %v2297_v44 = vsel %vm855_vm4, %v2859_v35, 0 }
 0xd9e   : > { %v2188_v51 = vpop.xlane.xlu0 %2187 }
 0xd9f   : > { %3297 = vrcp.f32 %v2188_v51 }
 0xda0   : > { %v2191_v21 = vpop.xlane.xlu1 %2190 }
 0xda1   : > { %3299 = vrcp.f32 %v2191_v21 }
 0xda2   : > { %v2033_v52 = vpop.permute.xlu0 %2032 }
 0xda3   : > { %v2070_v53 = vadd.f32 %v2069_v22, %v2033_v52  ;;  %v2073_v54 = vadd.f32 %v2072_v24, %v2033_v52 }
 0xda5   : > { %v2080_v55 = vpack.c.bf16 %v2070_v53, %v2070_v53  ;;  %v2081_v56 = vpack.c.bf16 %v2073_v54, %v2073_v54  ;;  %v2379_v53 = vsub.s32 4, %v3517_v13 }
 0xda7   : > { %v2202_v58 = vsel %vm855_vm4, %v2080_v55, 0  ;;  %v2248_v60 = vsel %vm855_vm4, %v2081_v56, 0  ;;  %v2380_v55 = vrot.slane %v3789_v36, %v2379_v53 }
 0xda8   : > { %3163 = vmatpush3.bf16.msra.mxu1 %v2202_v58  ;;  %3169 = vmatpush3.bf16.msra.mxu0 %v2248_v60  ;;  %v2385_v58 = vsub.s32 5, %v3517_v13 }
 0xda9   : > { %v3298_v61 = vpop.eup %3297  ;;  %3174 = vmatprep.subr.bf16.mxu1 %v3366_v3  ;;  %3180 = vmatprep.subr.bf16.mxu0 %v3366_v3 }
 0xdaa   : > { %v2194_v62 = vmul.f32 %v3298_v61, %v3294_v49  ;;  %v3266_v49 = vld [vmem:[%s3477_s24 + $0x8] sm:$0xff]  }
 0xdab   : > { %v3300_v63 = vpop.eup %3299 }
 0xdac   : > { %v2195_v1 = vmul.f32 %v3300_v63, %v3296_v50  ;;  %v2196_v39 = vpack.c.bf16 %v2194_v62, %v2194_v62  ;;  %v2386_v62 = vrot.slane %v3789_v36, %v2385_v58 }
 0xdae   : > { %3165 = vmatmul.mubr.msk.bf16.vlgmr.msra.gmra.mrb[56].mxu1 %vm735_vm3, %v2196_v39  ;;  %v2197_v2 = vpack.c.bf16 %v2195_v1, %v2195_v1 }
 0xdaf   : > { %3175 = vmatpush3.bf16.msra.mxu1 %v2297_v44  ;;  %3176 = vmatprep.mubr.msk.bf16.mxu1 %vm3367_vm1, %v3366_v3 }
 0xdb0   : > { %3171 = vmatmul.mubr.msk.bf16.vlgmr.msra.gmra.mrb[60].mxu0 %vm735_vm3, %v2197_v2  ;;  %3188 = vmatprep.subr.bf16.mxu1 %v3366_v3  ;;  %v3267_v2 = vld [vmem:[%s3477_s24 + $0x10] sm:$0xff]  }
 0xdb1   : > { %3184 = vmatprep.mubr.msk.bf16.mxu0 %vm3367_vm1, %v3366_v3  ;;  %3181 = vmatpush3.bf16.msra.mxu0 %v3263_v47 }
 0xdb2   : > { %3182 = vmatprep.subr.bf16.mxu0 %v3366_v3 }
 0xdb5   : > { %3183 = vmatpush3.bf16.msra.mxu0 %v3264_v59 }
 0xe81   : > { %v2238_v4 = vpop.f32.mrb[56].mxu1 }
 0xe82   : > { %v3166_v9 = vpop.f32.mrb[57].mxu1 }
 0xe83   : > { %v2241_v5 = vpop.f32.mrb[58].mxu1  ;;  %v2284_v6 = vpop.f32.mrb[60].mxu0  ;;  %v2396_v9 = vsub.s32 6, %v3517_v13 }
 0xe84   : > { %v2290_v7 = vpack.c.bf16 %v2284_v6, %v2238_v4  ;;  %v3167_v8 = vpop.f32.mrb[59].mxu1  ;;  %v3172_v10 = vpop.f32.mrb[61].mxu0  ;;  %v3268_v4 = vld [vmem:[%s3477_s24 + $0x18] sm:$0xff]  }
 0xe85   : > { %v2287_v11 = vpop.f32.mrb[62].mxu0  ;;  %v2397_v5 = vrot.slane %v3789_v36, %v2396_v9 }
 0xe86   : > { %v3173_v12 = vpop.f32.mrb[63].mxu0  ;;  %3177 = vmatmul.mubr.msk.bf16.vlgmr.msra.gmra.mrb[60].mxu1 %vm735_vm3, %v2290_v7 }
 0xe87   : > { %3196 = vmatprep.mubr.msk.bf16.mxu1 %vm3367_vm1, %v3366_v3  ;;  %3189 = vmatpush3.bf16.msra.mxu1 %v3265_v48 }
 0xe88   : > { %3190 = vmatprep.subr.bf16.mxu1 %v3366_v3 }
 0xe8b   : > { %3191 = vmatpush3.bf16.msra.mxu1 %v3266_v49  ;;  %v530_v49 = vld [vmem:[%s3447_s19 + $0x8] sm:$0x3]  ;;  %s3312_s19 = scalar_lea.vmem %s2590_s25, 256 }
 0xe8c   : > { %3192 = vmatprep.subr.bf16.mxu1 %v3366_v3  ;;  %p3313_p7 = scmp.ne.s32.totalorder %s2590_s25, %s3312_s19  ;;  %p3320_p11 = scmp.lt.s32.totalorder %s3312_s19, %s3312_s19 }
 0xe8e   : > { %p3314_p8 = pnand %p3313_p7, %p3828_p6  ;;  %p3321_p12 = por %p3320_p11, %p3319_p10 }
 0xe8f   : > { %3193 = vmatpush3.bf16.msra.mxu1 %v3267_v2 }
 0xe90   : > { %3194 = vmatprep.subr.bf16.mxu1 %v3366_v3  ;;  %p3315_p9 = pneg %p3314_p8 }
 0xe92   : > { %p3322_p13 = pnand %p3321_p12, %p3315_p9 }
 0xe93   : > { %3195 = vmatpush3.bf16.msra.mxu1 %v3268_v4 }
 0xf59   : > { %v2333_v40 = vpop.f32.mrb[60].mxu1 }
 0xf5a   : > { %v2340_v19 = vadd.f32 %v2333_v40, %v3748_v0  ;;  %v3178_v20 = vpop.f32.mrb[61].mxu1 }
 0xf5b   : > { %v2336_v22 = vpop.f32.mrb[62].mxu1 }
 0xf5c   : > { %v2346_v23 = vadd.f32 %v2345_v18, %v2340_v19  ;;  %v2341_v24 = vadd.f32 %v2336_v22, %v3751_v43  ;;  %v3179_v25 = vpop.f32.mrb[63].mxu1  ;;  %v2467_v19 = vsub.s32 7, %v3517_v13 }
 0xf5e   : > { %v2347_v26 = vadd.f32 %v2345_v18, %v2341_v24  ;;  %v2348_v28 = vadd.f32 %v3310_v27, %v2346_v23  ;;  %v2468_v3 = vrot.slane %v3789_v36, %v2467_v19 }
 0xf60   : > { %v2350_v29 = vsel %vm552_vm2, %v2348_v28, 0.0  ;;  %v2349_v31 = vadd.f32 %v3311_v30, %v2347_v26 }
 0xf61   : > { %2351 = vadd.xlane.f32.xlu1 %v2350_v29 }
 0xf62   : > { %v2353_v32 = vsel %vm552_vm2, %v2349_v31, 0.0 }
 0xf65   : > { %2354 = vadd.xlane.f32.xlu1 %v2353_v32 }
 0xfee   : > { %v2352_v0 = vpop.xlane.xlu1 %2351 }
 0xfef   : > { %v2357_v33 = vmul.f32 0.03125, %v2352_v0 }
 0xff1   : > { %v2359_v34 = vsub.f32 %v2348_v28, %v2357_v33 }
 0xff2   : > { %v2355_v37 = vpop.xlane.xlu1 %2354 }
 0xff3   : > { %v2358_v43 = vmul.f32 0.03125, %v2355_v37  ;;  %v2361_v38 = vmul.f32 %v2359_v34, %v2359_v34 }
 0xff5   : > { %v2360_v41 = vsub.f32 %v2349_v31, %v2358_v43  ;;  %v2363_v42 = vsel %vm552_vm2, %v2361_v38, 0.0 }
 0xff6   : > { %2364 = vadd.xlane.f32.xlu1 %v2363_v42 }
 0xff7   : > { %v2362_v45 = vmul.f32 %v2360_v41, %v2360_v41 }
 0xff9   : > { %v2366_v46 = vsel %vm552_vm2, %v2362_v45, 0.0 }
 0xffa   : > { %2367 = vadd.xlane.f32.xlu1 %v2366_v46 }
0x1083   : > { %v2365_v57 = vpop.xlane.xlu1 %2364 }
0x1084   : > { %v2369_v50 = vmul.f32 0.03125, %v2365_v57  ;;  %v2569_v57 = vrot.slane %v530_v49, %v3526_v17 }
0x1086   : > { %v2371_v16 = vadd.f32 1e-05, %v2369_v50 }
0x1087   : > { %v2368_v51 = vpop.xlane.xlu1 %2367 }
0x1088   : > { %3301 = vrsqrt.f32 %v2371_v16  ;;  %v2370_v21 = vmul.f32 0.03125, %v2368_v51  ;;  %v2575_v51 = vrot.slane %v530_v49, %v603_v14 }
0x108a   : > { %v2372_v52 = vadd.f32 1e-05, %v2370_v21 }
0x108c   : > { %3303 = vrsqrt.f32 %v2372_v52 }
0x1092   : > { %v3302_v54 = vpop.eup %3301 }
0x1093   : > { %v2375_v56 = vmul.f32 %v3302_v54, %v2359_v34 }
0x1095   : > { %v2381_v61 = vmul.f32 %v2380_v55, %v2375_v56 }
0x1096   : > { %v3304_v60 = vpop.eup %3303 }
0x1097   : > { %v2376_v35 = vmul.f32 %v3304_v60, %v2360_v41  ;;  %v2387_v1 = vadd.f32 %v2386_v62, %v2381_v61 }
0x1099   : > { %v2382_v63 = vmul.f32 %v2380_v55, %v2376_v35 }
0x109b   : > { %v2388_v39 = vadd.f32 %v2386_v62, %v2382_v63 }
0x109d   : > { %v2389_v44 = vpack.c.bf16 %v2388_v39, %v2387_v1 }
0x109f   : > { %3185 = vmatmul.mubr.msk.bf16.vlgmr.msra.gmra.mrb[64].mxu0 %vm552_vm2, %v2389_v44 }
0x1172   : > { %v2447_v6 = vpop.f32.mrb[64].mxu0 }
0x1173   : > { %v2448_v7 = vadd.f32 %v2447_v6, %v2397_v5  ;;  %v3186_v8 = vpop.f32.mrb[65].mxu0 }
0x1174   : > { %v2450_v10 = vpop.f32.mrb[66].mxu0 }
0x1175   : > { %v2451_v11 = vadd.f32 %v2450_v10, %v2397_v5  ;;  %v3187_v12 = vpop.f32.mrb[67].mxu0  ;;  %v2454_v15 = vmax.f32 %v2448_v7, 0.0 }
0x1177   : > { %v2455_v18 = vmax.f32 %v2451_v11, 0.0 }
0x1179   : > { %v2456_v40 = vpack.c.bf16 %v2455_v18, %v2454_v15 }
0x117b   : > { %3197 = vmatmul.mubr.msk.bf16.vlgmr.msra.gmra.mrb[64].mxu1 %vm2493_vm5, %v2456_v40 }
0x124e   : > { %v2531_v20 = vpop.f32.mrb[64].mxu1 }
0x124f   : > { %v2532_v22 = vadd.f32 %v2531_v20, %v2468_v3  ;;  %v3198_v23 = vpop.f32.mrb[65].mxu1 }
0x1250   : > { %v2534_v24 = vpop.f32.mrb[66].mxu1 }
0x1251   : > { %v2535_v25 = vadd.f32 %v2534_v24, %v2468_v3  ;;  %v3199_v26 = vpop.f32.mrb[67].mxu1  ;;  %v2538_v27 = vadd.f32 %v2532_v22, %v2387_v1 }
0x1253   : > { %v2540_v28 = vsel %vm552_vm2, %v2538_v27, 0.0  ;;  %v2539_v29 = vadd.f32 %v2535_v25, %v2388_v39 }
0x1254   : > { %2541 = vadd.xlane.f32.xlu1 %v2540_v28 }
0x1255   : > { %v2543_v30 = vsel %vm552_vm2, %v2539_v29, 0.0 }
0x1258   : > { %2544 = vadd.xlane.f32.xlu1 %v2543_v30 }
0x12e1   : > { %v2542_v31 = vpop.xlane.xlu1 %2541 }
0x12e2   : > { %v2546_v32 = vmul.f32 0.03125, %v2542_v31 }
0x12e4   : > { %v2548_v0 = vsub.f32 %v2538_v27, %v2546_v32 }
0x12e5   : > { %v2545_v33 = vpop.xlane.xlu1 %2544 }
0x12e6   : > { %v2547_v34 = vmul.f32 0.03125, %v2545_v33  ;;  %v2550_v36 = vmul.f32 %v2548_v0, %v2548_v0 }
0x12e8   : > { %v2549_v37 = vsub.f32 %v2539_v29, %v2547_v34  ;;  %v2552_v43 = vsel %vm552_vm2, %v2550_v36, 0.0 }
0x12e9   : > { %2553 = vadd.xlane.f32.xlu0 %v2552_v43 }
0x12ea   : > { %v2551_v38 = vmul.f32 %v2549_v37, %v2549_v37 }
0x12ec   : > { %v2555_v41 = vsel %vm552_vm2, %v2551_v38, 0.0 }
0x12ed   : > { %2556 = vadd.xlane.f32.xlu1 %v2555_v41 }
0x1376   : > { %v2554_v42 = vpop.xlane.xlu0 %2553 }
0x1377   : > { %v2558_v45 = vmul.f32 0.03125, %v2554_v42 }
0x1379   : > { %v2560_v46 = vadd.f32 1e-05, %v2558_v45 }
0x137a   : > { %v2557_v47 = vpop.xlane.xlu1 %2556 }
0x137b   : > { %3305 = vrsqrt.f32 %v2560_v46  ;;  %v2559_v59 = vmul.f32 0.03125, %v2557_v47 }
0x137d   : > { %v2561_v48 = vadd.f32 1e-05, %v2559_v59 }
0x137f   : > { %3307 = vrsqrt.f32 %v2561_v48 }
0x1385   : > { %v3306_v50 = vpop.eup %3305 }
0x1386   : > { %v2564_v16 = vmul.f32 %v3306_v50, %v2548_v0 }
0x1388   : > { %v2570_v21 = vmul.f32 %v2569_v57, %v2564_v16 }
0x1389   : > { %v3308_v52 = vpop.eup %3307 }
0x138a   : > { %v2565_v53 = vmul.f32 %v3308_v52, %v2549_v37  ;;  %v2576_v54 = vadd.f32 %v2575_v51, %v2570_v21 }
0x138c   : > { %v2571_v55 = vmul.f32 %v2569_v57, %v2565_v53  ;;  %2578 = vst.msk [vmem:[#allocation2] sm:$0xff] %vm552_vm2, %v2576_v54 }
0x138e   : > { %v2577_v17 = vadd.f32 %v2575_v51, %v2571_v55 }
0x1390   : > { %2579 = vst.msk [vmem:[#allocation2 + $0x8] sm:$0xff] %vm552_vm2, %v2577_v17 }
0x1391   : > { %3325 = shalt.err (!%p3322_p13)
}
0x1392   : > { %s3326_s20 = scalar_lea.hbm %s3873_s9, 256 }
0x1393   : > { %p3327_p0 = scmp.ne.s32.totalorder %s3873_s9, %s3326_s20  ;;  %p3332_p3 = scmp.lt.u32.totalorder %s3326_s20, %s3873_s9 }
0x1395   : > { %p3328_p1 = pnand %p3327_p0, %p3828_p6 }
0x1397   : > { %p3329_p2 = pneg %p3328_p1 }
0x1399   : > { %p3334_p4 = pnand %p3332_p3, %p3329_p2 }
0x139b   : > { %3337 = shalt.err (!%p3334_p4)
}
0x139c   : > { %s3373_s26 = smov 128   ;;  %s3374_s12 = smov 8  }
0x139d   : > { %3201 = dma.vmem_to_hbm [thread:$0]  (%p3828_p6), %s2590_s25, 256, %s3873_s9, [#allocation3], %s3373_s26, %s3373_s26, %s3374_s12  }
0x139e   : > { %3351 = dma.done.wait (%p3828_p6), [#allocation3], 256  }
0x139f   : > { %3353 = vsyncadd (%p3828_p6), [#allocation3], 4294967040 }
0x13a0 PF: > { %s20_s11 = sadd.s32 1, %s3364_s11   ;;  %s3880_s30 = smov %s3360_s10 }
0x13a1   : > { %p17_p5 = scmp.ge.s32.totalorder %s20_s11, 4   ;;  %s3881_s10 = smov %s3883_s13 }
0x13a3   :  { %19 = sbr.rel (!%p17_p5) target bundleno = 5 (0x5), region = 124 }
0x13aa   :  { %2605 = vsyncpa [#allocation3], 1 }
0x13ab   :  { %2607 = vsyncpa [#allocation3 + $0x1], 1 }

</bundles_post_ra>
